<compile_context>
chip_gen: v6e
topology: v6e:2x2x1
jax: 0.10.0
libtpu: 0.0.40
codegen_flags: <defaults>
</compile_context>

<pallas_src>
import functools

import jax
import jax.numpy as jnp
from jax.experimental import pallas as pl
from jax.experimental.pallas import tpu as pltpu

EPS = 1e-3  # matches BatchNorm2d(768, eps=0.001)


def bn2d_kernel(x_ref, gamma_ref, beta_ref, o_ref):
    # x_ref: (tc, R) block -- tc channels on the sublane axis, R = N*H*W on the
    # lane axis (full row per block, so no padded lanes enter the reductions).
    # gamma_ref / beta_ref: (tc, 1) per-channel affine parameters.
    r = x_ref.shape[1]
    inv_r = 1.0 / r                                    # static divisor (full row per block)

    x = x_ref[...].astype(jnp.float32)                 # (tc, R)

    # Two-pass moments over the lane axis (robust to non-zero-centered inputs).
    mean = jnp.sum(x, axis=1, keepdims=True) * inv_r   # (tc, 1)
    diff = x - mean
    var = jnp.sum(diff * diff, axis=1, keepdims=True) * inv_r   # biased variance

    # Fold affine into per-channel scale / bias (tiny (tc, 1) vectors).
    scale = gamma_ref[...].astype(jnp.float32) * jax.lax.rsqrt(var + EPS)
    bias = beta_ref[...].astype(jnp.float32) - mean * scale

    # Final normalize: 2 VPU ops per element with lane-broadcast scale/bias.
    o_ref[...] = (x * scale + bias).astype(o_ref.dtype)


def _pick_channel_tile(c: int) -> int:
    # ~2-3 grid steps for C=768 (per review: keep step count small, each grid
    # step costs ~0.35us of pipeline overhead).  Tile must divide C and be a
    # multiple of 8 (sublane) unless it equals C.
    for tc in (256, 384, 128, 64, 32, 16, 8):
        if c % tc == 0:
            return tc
    return c


@functools.partial(jax.jit, static_argnames=())
def batchnorm2d(x_nchw, gamma, beta):
    """x_nchw: (N, C, H, W); gamma, beta: (C,). Returns (N, C, H, W)."""
    n, c, h, w = x_nchw.shape
    # For N == 1 the NCHW buffer *is* a (C, H*W) matrix: free reshape, no HBM transpose.
    assert n == 1, "layout fast-path assumes N == 1 (as in the reference module)"
    r = n * h * w

    x2d = x_nchw.reshape(c, r)        # free reshape of the HBM buffer
    g2d = gamma.reshape(c, 1)
    b2d = beta.reshape(c, 1)

    tc = _pick_channel_tile(c)
    grid = (c // tc,)

    y2d = pl.pallas_call(
        bn2d_kernel,
        out_shape=jax.ShapeDtypeStruct((c, r), x_nchw.dtype),
        grid=grid,
        in_specs=[
            pl.BlockSpec((tc, r), lambda i: (i, 0)),   # full row per block -> exact stats
            pl.BlockSpec((tc, 1), lambda i: (i, 0)),
            pl.BlockSpec((tc, 1), lambda i: (i, 0)),
        ],
        out_specs=pl.BlockSpec((tc, r), lambda i: (i, 0)),
        # Channel blocks are independent -> shard across TensorCores on v7x.
        compiler_params=pltpu.CompilerParams(dimension_semantics=("parallel",)),
        # x and y share shape/dtype: reuse the buffer when x is donatable.
        input_output_aliases={0: 0},
        cost_estimate=pl.CostEstimate(
            flops=7 * c * r,
            transcendentals=c,                     # one rsqrt per channel
            bytes_accessed=2 * c * r * x_nchw.dtype.itemsize + 2 * c * 4,
        ),
    )(x2d, g2d, b2d)

    return y2d.reshape(n, c, h, w)    # free reshape back to NCHW


def batchnorm2d_ref(x_nchw, gamma, beta):
    x = x_nchw.astype(jnp.float32)
    mean = jnp.mean(x, axis=(0, 2, 3), keepdims=True)
    var = jnp.mean((x - mean) ** 2, axis=(0, 2, 3), keepdims=True)
    y = (x - mean) * jax.lax.rsqrt(var + EPS)
    return (y * gamma.reshape(1, -1, 1, 1) + beta.reshape(1, -1, 1, 1)).astype(x_nchw.dtype)


if __name__ == "__main__":
    key = jax.random.PRNGKey(0)
    kx, kg, kb = jax.random.split(key, 3)

    # Shapes implied by the module's forward: x291 = randn([1, 768, 14, 14]).
    N, C, H, W = 1, 768, 14, 14
    x = jax.random.normal(kx, (N, C, H, W), dtype=jnp.float32)
    # Deterministic, non-trivial affine parameters of shape (C,).
    gamma = 1.0 + 0.1 * jax.random.normal(kg, (C,), dtype=jnp.float32)
    beta = 0.1 * jax.random.normal(kb, (C,), dtype=jnp.float32)

    y_ref = jax.block_until_ready(batchnorm2d_ref(x, gamma, beta))
    y = jax.block_until_ready(batchnorm2d(x, gamma, beta))

    assert y.shape == (N, C, H, W)
    assert jnp.allclose(y, y_ref, atol=1e-4, rtol=1e-4), "mismatch vs reference"
    print("KERNEL_OK")
</pallas_src>

<mosaic_0001>
module attributes {stable_mosaic.version = 11 : i64} {
  func.func @bn2d_kernel(%arg0: i32, %arg1: memref<256x196xf32, #tpu.memory_space<vmem>>, %arg2: memref<256x1xf32, #tpu.memory_space<vmem>>, %arg3: memref<256x1xf32, #tpu.memory_space<vmem>>, %arg4: memref<256x196xf32, #tpu.memory_space<vmem>>) attributes {dimension_semantics = [#tpu.dimension_semantics<parallel>], iteration_bounds = array<i64: 3>, scalar_prefetch = 0 : i64, scratch_operands = 0 : i64, tpu.core_type = #tpu.core_type<tc>, window_params = [{transform_indices = @transform_0, window_bounds = array<i64: 256, 196>}, {transform_indices = @transform_1, window_bounds = array<i64: 256, 1>}, {transform_indices = @transform_2, window_bounds = array<i64: 256, 1>}, {transform_indices = @transform_3, window_bounds = array<i64: 256, 196>}]} {
    %c0 = arith.constant 0 : index
    %c0_0 = arith.constant 0 : index
    %0 = vector.load %arg1[%c0, %c0_0] : memref<256x196xf32, #tpu.memory_space<vmem>>, vector<256x196xf32>
    %cst = arith.constant dense<0.000000e+00> : vector<256xf32>
    %1 = vector.multi_reduction <add>, %0, %cst [1] : vector<256x196xf32> to vector<256xf32>
    %2 = vector.shape_cast %1 : vector<256xf32> to vector<256x1xf32>
    %cst_1 = arith.constant 0.00510204071 : f32
    %3 = vector.broadcast %cst_1 : f32 to vector<256x1xf32>
    %4 = arith.mulf %2, %3 : vector<256x1xf32>
    %5 = vector.broadcast %4 : vector<256x1xf32> to vector<256x196xf32>
    %6 = arith.subf %0, %5 : vector<256x196xf32>
    %7 = arith.mulf %6, %6 : vector<256x196xf32>
    %cst_2 = arith.constant dense<0.000000e+00> : vector<256xf32>
    %8 = vector.multi_reduction <add>, %7, %cst_2 [1] : vector<256x196xf32> to vector<256xf32>
    %9 = vector.shape_cast %8 : vector<256xf32> to vector<256x1xf32>
    %cst_3 = arith.constant 0.00510204071 : f32
    %10 = vector.broadcast %cst_3 : f32 to vector<256x1xf32>
    %11 = arith.mulf %9, %10 : vector<256x1xf32>
    %c0_4 = arith.constant 0 : index
    %c0_5 = arith.constant 0 : index
    %12 = vector.load %arg2[%c0_4, %c0_5] : memref<256x1xf32, #tpu.memory_space<vmem>>, vector<256x1xf32>
    %cst_6 = arith.constant 1.000000e-03 : f32
    %13 = vector.broadcast %cst_6 : f32 to vector<256x1xf32>
    %14 = arith.addf %11, %13 : vector<256x1xf32>
    %15 = math.rsqrt %14 : vector<256x1xf32>
    %16 = arith.mulf %12, %15 : vector<256x1xf32>
    %c0_7 = arith.constant 0 : index
    %c0_8 = arith.constant 0 : index
    %17 = vector.load %arg3[%c0_7, %c0_8] : memref<256x1xf32, #tpu.memory_space<vmem>>, vector<256x1xf32>
    %18 = arith.mulf %4, %16 : vector<256x1xf32>
    %19 = arith.subf %17, %18 : vector<256x1xf32>
    %20 = vector.broadcast %16 : vector<256x1xf32> to vector<256x196xf32>
    %21 = arith.mulf %0, %20 : vector<256x196xf32>
    %22 = vector.broadcast %19 : vector<256x1xf32> to vector<256x196xf32>
    %23 = arith.addf %21, %22 : vector<256x196xf32>
    %c0_9 = arith.constant 0 : index
    %c0_10 = arith.constant 0 : index
    %24 = vector.load %arg4[%c0_9, %c0_10] : memref<256x196xf32, #tpu.memory_space<vmem>>, vector<256x196xf32>
    tpu.vector_store %arg4[%c0_9, %c0_10], %23 {strides = array<i32>} : memref<256x196xf32, #tpu.memory_space<vmem>>, vector<256x196xf32>,
    return
  }
  func.func @transform_0(%arg0: i32) -> (i32, i32) {
    %c0_i32 = arith.constant 0 : i32
    %c0_i32_0 = arith.constant 0 : i32
    return %arg0, %c0_i32 : i32, i32
  }
  func.func @transform_1(%arg0: i32) -> (i32, i32) {
    %c0_i32 = arith.constant 0 : i32
    %c0_i32_0 = arith.constant 0 : i32
    return %arg0, %c0_i32 : i32, i32
  }
  func.func @transform_2(%arg0: i32) -> (i32, i32) {
    %c0_i32 = arith.constant 0 : i32
    %c0_i32_0 = arith.constant 0 : i32
    return %arg0, %c0_i32 : i32, i32
  }
  func.func @transform_3(%arg0: i32) -> (i32, i32) {
    %c0_i32 = arith.constant 0 : i32
    %c0_i32_0 = arith.constant 0 : i32
    return %arg0, %c0_i32 : i32, i32
  }
}

</mosaic_0001>

<bundles_post_ra>
// kernel: batchnorm2d.1
= control target key start
LH: loop header
LB: loop body
LE: loop exit
PB: predicated region body
PF: predicated region fallthrough
CT: control target
= control target key end

     0   :  { %s1681_s12 = smov 0   ;;  %s2769_s0 = inlined_call_operand.vmem [shape: f32[768,196], index: 0, kind: input, shape index: {}, may-alias: {0,3}]   ;;  %s2770_s1 = inlined_call_operand.vmem [shape: f32[768,1], index: 1, kind: input, shape index: {}]   ;;  %s2771_s2 = inlined_call_operand.vmem [shape: f32[768,1], index: 2, kind: input, shape index: {}]   ;;  %s2772_s3 = inlined_call_operand.vmem [shape: f32[768,196], index: 3, kind: output, shape index: {}, may-alias: {0,3}]  }
   0x1 LB: > { %s1554_s13 = sadd.s32 4294967295, %s1658_s12   ;;  %p1558_p0 = scmp.ge.s32.totalorder %s1658_s12, 1  ;;  %s1658_s12 = sphi %s1681_s12, %s13_s12  }
   0x2   : > { %p161_p1 = scmp.lt.s32.totalorder %s1658_s12, 4 }
   0x4   : > { %p162_p2 = pnand %p1558_p0, %p161_p1 }
   0x6   : > { %165 = sbr.rel (%p162_p2) target bundleno = 593 (0x251), region = 32 }
   0xb   : > { %s1559_s14 = sshll.u32 %s1554_s13, 5  ;;  %vm287_vm0 = vcmask 556032  }
   0xc   : > { %p198_p3 = scmp.lt.s32.totalorder %s1559_s14, 95 }
   0xe   : > { %s3036_s14 = smov (!%p198_p3, %s1559_s14), 95 }
   0xf   : > { %s1571_s15 = sshll.u32 %s3036_s14, 4  ;;  %s1563_s19 = sshll.u32 %s3036_s14, 3 }
  0x10   : > { %s1697_s18 = scalar_lea.vmem %s2769_s0, %s1571_s15  ;;  %s2215_s22 = scalar_lea.vmem %s2770_s1, %s1563_s19 }
  0x11   : > { %v1700_v0 = vld [vmem:[%s1697_s18] sm:$0xff]  ;;  %v1703_v1 = vld [vmem:[%s1697_s18 + $0x8] sm:$0xff]  ;;  %v1714_v5 = vld [vmem:[%s1697_s18 + $0x10] sm:$0xff]  ;;  %s2221_s25 = scalar_lea.vmem %s2771_s2, %s1563_s19  ;;  %s2546_s28 = scalar_lea.vmem %s2772_s3, %s1571_s15 }
  0x12   : > { %2863 = vst [vmem:[#allocation2_spill] sm:$0xff] %v1700_v0  ;;  %2864 = vst [vmem:[#allocation3_spill] sm:$0xff] %v1703_v1  ;;  %v1706_v2 = vld [vmem:[%s1697_s18 + $0x20] sm:$0xff]  ;;  %v288_v3 = vsel %vm287_vm0, %v1703_v1, 0.0  ;;  %v1711_v4 = vld [vmem:[%s1697_s18 + $0x28] sm:$0xff] }
  0x13   : > { %2865 = vst [vmem:[#allocation4_spill] sm:$0xff] %v1706_v2  ;;  %2866 = vst [vmem:[#allocation5_spill] sm:$0xff] %v1711_v4  ;;  %v1717_v6 = vld [vmem:[%s1697_s18 + $0x18] sm:$0xff]  ;;  %v289_v7 = vadd.f32 %v288_v3, %v1700_v0  ;;  %v296_v8 = vsel %vm287_vm0, %v1711_v4, 0.0  ;;  %v1725_v10 = vld [vmem:[%s1697_s18 + $0x30] sm:$0xff] }
  0x14   : > { %v292_v9 = vsel %vm287_vm0, %v1717_v6, 0.0  ;;  %v1728_v11 = vld [vmem:[%s1697_s18 + $0x38] sm:$0xff]  ;;  %v297_v12 = vadd.f32 %v296_v8, %v1706_v2  ;;  %v1734_v14 = vld [vmem:[%s1697_s18 + $0x48] sm:$0xff]  ;;  %v1742_v18 = vld [vmem:[%s1697_s18 + $0x40] sm:$0xff] }
  0x15   : > { %v300_v13 = vsel %vm287_vm0, %v1728_v11, 0.0  ;;  %2867 = vst [vmem:[#allocation6_spill] sm:$0xff] %v1734_v14  ;;  %v1737_v15 = vld [vmem:[%s1697_s18 + $0x58] sm:$0xff]  ;;  %290 = vadd.xlane.f32.xlu0 %v289_v7  ;;  %v293_v16 = vadd.f32 %v292_v9, %v1714_v5  ;;  %2869 = vst [vmem:[#allocation8_spill] sm:$0xff] %v1742_v18  ;;  %v304_v19 = vsel %vm287_vm0, %v1734_v14, 0.0  ;;  %v1747_v20 = vld [vmem:[%s1697_s18 + $0x50] sm:$0xff] }
  0x16   : > { %2868 = vst [vmem:[#allocation7_spill] sm:$0xff] %v1737_v15  ;;  %298 = vadd.xlane.f32.xlu1 %v297_v12  ;;  %v301_v17 = vadd.f32 %v300_v13, %v1725_v10  ;;  %2870 = vst [vmem:[#allocation9_spill] sm:$0xff] %v1747_v20  ;;  %v308_v21 = vsel %vm287_vm0, %v1737_v15, 0.0  ;;  %v1752_v22 = vld [vmem:[%s1697_s18 + $0x68] sm:$0xff]  ;;  %v1755_v23 = vld [vmem:[%s1697_s18 + $0x78] sm:$0xff]  ;;  %v305_v24 = vadd.f32 %v304_v19, %v1742_v18 }
  0x17   : > { %2871 = vst [vmem:[#allocation10_spill] sm:$0xff] %v1752_v22  ;;  %2872 = vst [vmem:[#allocation11_spill] sm:$0xff] %v1755_v23  ;;  %v309_v25 = vadd.f32 %v308_v21, %v1747_v20  ;;  %v1760_v26 = vld [vmem:[%s1697_s18 + $0x60] sm:$0xff]  ;;  %v312_v27 = vsel %vm287_vm0, %v1752_v22, 0.0  ;;  %v1765_v28 = vld [vmem:[%s1697_s18 + $0x70] sm:$0xff]  ;;  %v316_v29 = vsel %vm287_vm0, %v1755_v23, 0.0 }
  0x18   : > { %2873 = vst [vmem:[#allocation12_spill] sm:$0xff] %v1760_v26  ;;  %2874 = vst [vmem:[#allocation13_spill] sm:$0xff] %v1765_v28  ;;  %v1770_v30 = vld [vmem:[%s1697_s18 + $0x88] sm:$0xff]  ;;  %v1773_v31 = vld [vmem:[%s1697_s18 + $0x98] sm:$0xff]  ;;  %v313_v32 = vadd.f32 %v312_v27, %v1760_v26  ;;  %v317_v33 = vadd.f32 %v316_v29, %v1765_v28 }
  0x19   : > { %294 = vadd.xlane.f32.xlu0 %v293_v16  ;;  %2875 = vst [vmem:[#allocation14_spill] sm:$0xff] %v1770_v30  ;;  %2876 = vst [vmem:[#allocation15_spill] sm:$0xff] %v1773_v31  ;;  %v1778_v34 = vld [vmem:[%s1697_s18 + $0x80] sm:$0xff]  ;;  %v320_v35 = vsel %vm287_vm0, %v1770_v30, 0.0  ;;  %v1783_v36 = vld [vmem:[%s1697_s18 + $0x90] sm:$0xff]  ;;  %v324_v37 = vsel %vm287_vm0, %v1773_v31, 0.0 }
  0x1a   : > { %302 = vadd.xlane.f32.xlu1 %v301_v17  ;;  %2877 = vst [vmem:[#allocation16_spill] sm:$0xff] %v1778_v34  ;;  %2878 = vst [vmem:[#allocation17_spill] sm:$0xff] %v1783_v36  ;;  %v1788_v38 = vld [vmem:[%s1697_s18 + $0xa8] sm:$0xff]  ;;  %v1791_v39 = vld [vmem:[%s1697_s18 + $0xb8] sm:$0xff]  ;;  %v321_v40 = vadd.f32 %v320_v35, %v1778_v34  ;;  %v325_v41 = vadd.f32 %v324_v37, %v1783_v36 }
  0x1b   : > { %2879 = vst [vmem:[#allocation18_spill] sm:$0xff] %v1788_v38  ;;  %2880 = vst [vmem:[#allocation19_spill] sm:$0xff] %v1791_v39  ;;  %v1796_v42 = vld [vmem:[%s1697_s18 + $0xa0] sm:$0xff]  ;;  %v328_v43 = vsel %vm287_vm0, %v1788_v38, 0.0  ;;  %v1801_v44 = vld [vmem:[%s1697_s18 + $0xb0] sm:$0xff]  ;;  %v332_v45 = vsel %vm287_vm0, %v1791_v39, 0.0 }
  0x1c   : > { %2881 = vst [vmem:[#allocation20_spill] sm:$0xff] %v1796_v42  ;;  %2882 = vst [vmem:[#allocation21_spill] sm:$0xff] %v1801_v44  ;;  %v1806_v46 = vld [vmem:[%s1697_s18 + $0xc8] sm:$0xff]  ;;  %v1809_v47 = vld [vmem:[%s1697_s18 + $0xd8] sm:$0xff]  ;;  %v329_v48 = vadd.f32 %v328_v43, %v1796_v42  ;;  %v333_v49 = vadd.f32 %v332_v45, %v1801_v44 }
  0x1d   : > { %306 = vadd.xlane.f32.xlu0 %v305_v24  ;;  %2883 = vst [vmem:[#allocation22_spill] sm:$0xff] %v1806_v46  ;;  %2884 = vst [vmem:[#allocation23_spill] sm:$0xff] %v1809_v47  ;;  %v1814_v50 = vld [vmem:[%s1697_s18 + $0xc0] sm:$0xff]  ;;  %v336_v51 = vsel %vm287_vm0, %v1806_v46, 0.0  ;;  %v1819_v52 = vld [vmem:[%s1697_s18 + $0xd0] sm:$0xff]  ;;  %v340_v53 = vsel %vm287_vm0, %v1809_v47, 0.0 }
  0x1e   : > { %310 = vadd.xlane.f32.xlu1 %v309_v25  ;;  %2885 = vst [vmem:[#allocation24_spill] sm:$0xff] %v1814_v50  ;;  %2886 = vst [vmem:[#allocation25_spill] sm:$0xff] %v1819_v52  ;;  %v1824_v54 = vld [vmem:[%s1697_s18 + $0xe8] sm:$0xff]  ;;  %v1827_v55 = vld [vmem:[%s1697_s18 + $0xf8] sm:$0xff]  ;;  %v337_v56 = vadd.f32 %v336_v51, %v1814_v50  ;;  %v341_v57 = vadd.f32 %v340_v53, %v1819_v52 }
  0x1f   : > { %2887 = vst [vmem:[#allocation26_spill] sm:$0xff] %v1824_v54  ;;  %2888 = vst [vmem:[#allocation27_spill] sm:$0xff] %v1827_v55  ;;  %v1832_v58 = vld [vmem:[%s1697_s18 + $0xe0] sm:$0xff]  ;;  %v344_v59 = vsel %vm287_vm0, %v1824_v54, 0.0  ;;  %v1837_v60 = vld [vmem:[%s1697_s18 + $0xf0] sm:$0xff]  ;;  %v348_v61 = vsel %vm287_vm0, %v1827_v55, 0.0 }
  0x20   : > { %2889 = vst [vmem:[#allocation28_spill] sm:$0xff] %v1832_v58  ;;  %2890 = vst [vmem:[#allocation29_spill] sm:$0xff] %v1837_v60  ;;  %v1842_v62 = vld [vmem:[%s1697_s18 + $0x108] sm:$0xff]  ;;  %v1845_v63 = vld [vmem:[%s1697_s18 + $0x118] sm:$0xff]  ;;  %v345_v3 = vadd.f32 %v344_v59, %v1832_v58  ;;  %v349_v7 = vadd.f32 %v348_v61, %v1837_v60 }
  0x21   : > { %314 = vadd.xlane.f32.xlu0 %v313_v32  ;;  %2891 = vst [vmem:[#allocation30_spill] sm:$0xff] %v1842_v62  ;;  %2892 = vst [vmem:[#allocation31_spill] sm:$0xff] %v1845_v63  ;;  %v1850_v8 = vld [vmem:[%s1697_s18 + $0x100] sm:$0xff]  ;;  %v352_v9 = vsel %vm287_vm0, %v1842_v62, 0.0  ;;  %v1855_v12 = vld [vmem:[%s1697_s18 + $0x110] sm:$0xff]  ;;  %v356_v13 = vsel %vm287_vm0, %v1845_v63, 0.0 }
  0x22   : > { %318 = vadd.xlane.f32.xlu1 %v317_v33  ;;  %2893 = vst [vmem:[#allocation32_spill] sm:$0xff] %v1850_v8  ;;  %2894 = vst [vmem:[#allocation33_spill] sm:$0xff] %v1855_v12  ;;  %v1860_v16 = vld [vmem:[%s1697_s18 + $0x128] sm:$0xff]  ;;  %v1863_v17 = vld [vmem:[%s1697_s18 + $0x138] sm:$0xff]  ;;  %v353_v19 = vadd.f32 %v352_v9, %v1850_v8  ;;  %v357_v21 = vadd.f32 %v356_v13, %v1855_v12 }
  0x23   : > { %2895 = vst [vmem:[#allocation34_spill] sm:$0xff] %v1860_v16  ;;  %2896 = vst [vmem:[#allocation35_spill] sm:$0xff] %v1863_v17  ;;  %v1868_v24 = vld [vmem:[%s1697_s18 + $0x120] sm:$0xff]  ;;  %v360_v25 = vsel %vm287_vm0, %v1860_v16, 0.0  ;;  %v1873_v27 = vld [vmem:[%s1697_s18 + $0x130] sm:$0xff]  ;;  %v364_v29 = vsel %vm287_vm0, %v1863_v17, 0.0 }
  0x24   : > { %2897 = vst [vmem:[#allocation36_spill] sm:$0xff] %v1868_v24  ;;  %2898 = vst [vmem:[#allocation37_spill] sm:$0xff] %v1873_v27  ;;  %v1878_v32 = vld [vmem:[%s1697_s18 + $0x148] sm:$0xff]  ;;  %v1881_v33 = vld [vmem:[%s1697_s18 + $0x158] sm:$0xff]  ;;  %v361_v35 = vadd.f32 %v360_v25, %v1868_v24  ;;  %v365_v37 = vadd.f32 %v364_v29, %v1873_v27 }
  0x25   : > { %322 = vadd.xlane.f32.xlu0 %v321_v40  ;;  %2899 = vst [vmem:[#allocation38_spill] sm:$0xff] %v1878_v32  ;;  %2900 = vst [vmem:[#allocation39_spill] sm:$0xff] %v1881_v33  ;;  %v1886_v40 = vld [vmem:[%s1697_s18 + $0x140] sm:$0xff]  ;;  %v1891_v43 = vld [vmem:[%s1697_s18 + $0x150] sm:$0xff]  ;;  %v372_v45 = vsel %vm287_vm0, %v1881_v33, 0.0 }
  0x26   : > { %326 = vadd.xlane.f32.xlu1 %v325_v41  ;;  %2901 = vst [vmem:[#allocation40_spill] sm:$0xff] %v1886_v40  ;;  %v368_v41 = vsel %vm287_vm0, %v1878_v32, 0.0  ;;  %2902 = vst [vmem:[#allocation41_spill] sm:$0xff] %v1891_v43  ;;  %v373_v53 = vadd.f32 %v372_v45, %v1891_v43  ;;  %v1909_v59 = vld [vmem:[%s1697_s18 + $0x170] sm:$0xff] }
  0x27   : > { %v369_v51 = vadd.f32 %v368_v41, %v1886_v40  ;;  %2906 = vst [vmem:[#allocation45_spill] sm:$0xff] %v1909_v59  ;;  %v1927_v25 = vld [vmem:[%s1697_s18 + $0x190] sm:$0xff] }
  0x28   : > { %2910 = vst [vmem:[#allocation49_spill] sm:$0xff] %v1927_v25 }
  0x29   : > { %330 = vadd.xlane.f32.xlu0 %v329_v48  ;;  %v1896_v48 = vld [vmem:[%s1697_s18 + $0x168] sm:$0xff] }
  0x2a   : > { %334 = vadd.xlane.f32.xlu1 %v333_v49  ;;  %2903 = vst [vmem:[#allocation42_spill] sm:$0xff] %v1896_v48  ;;  %v1899_v49 = vld [vmem:[%s1697_s18 + $0x178] sm:$0xff] }
  0x2b   : > { %2904 = vst [vmem:[#allocation43_spill] sm:$0xff] %v1899_v49  ;;  %v380_v61 = vsel %vm287_vm0, %v1899_v49, 0.0 }
  0x2c   : > { %v381_v13 = vadd.f32 %v380_v61, %v1909_v59 }
  0x2d   : > { %338 = vadd.xlane.f32.xlu0 %v337_v56  ;;  %v1904_v56 = vld [vmem:[%s1697_s18 + $0x160] sm:$0xff] }
  0x2e   : > { %342 = vadd.xlane.f32.xlu1 %v341_v57  ;;  %2905 = vst [vmem:[#allocation44_spill] sm:$0xff] %v1904_v56  ;;  %v376_v57 = vsel %vm287_vm0, %v1896_v48, 0.0 }
  0x2f   : > { %v377_v9 = vadd.f32 %v376_v57, %v1904_v56  ;;  %v1945_v57 = vld [vmem:[%s1697_s18 + $0x1b0] sm:$0xff] }
  0x30   : > { %2914 = vst [vmem:[#allocation53_spill] sm:$0xff] %v1945_v57 }
  0x31   : > { %346 = vadd.xlane.f32.xlu0 %v345_v3  ;;  %v1914_v3 = vld [vmem:[%s1697_s18 + $0x188] sm:$0xff] }
  0x32   : > { %350 = vadd.xlane.f32.xlu1 %v349_v7  ;;  %2907 = vst [vmem:[#allocation46_spill] sm:$0xff] %v1914_v3  ;;  %v1917_v7 = vld [vmem:[%s1697_s18 + $0x198] sm:$0xff] }
  0x33   : > { %2908 = vst [vmem:[#allocation47_spill] sm:$0xff] %v1917_v7  ;;  %v388_v29 = vsel %vm287_vm0, %v1917_v7, 0.0  ;;  %v1950_v7 = vld [vmem:[%s1697_s18 + $0x1c8] sm:$0xff] }
  0x34   : > { %v389_v45 = vadd.f32 %v388_v29, %v1927_v25  ;;  %2915 = vst [vmem:[#allocation54_spill] sm:$0xff] %v1950_v7  ;;  %v1958_v29 = vld [vmem:[%s1697_s18 + $0x1c0] sm:$0xff]  ;;  %v1963_v25 = vld [vmem:[%s1697_s18 + $0x1d0] sm:$0xff] }
  0x35   : > { %354 = vadd.xlane.f32.xlu0 %v353_v19  ;;  %v1922_v19 = vld [vmem:[%s1697_s18 + $0x180] sm:$0xff]  ;;  %2917 = vst [vmem:[#allocation56_spill] sm:$0xff] %v1958_v29  ;;  %2918 = vst [vmem:[#allocation57_spill] sm:$0xff] %v1963_v25 }
  0x36   : > { %358 = vadd.xlane.f32.xlu1 %v357_v21  ;;  %2909 = vst [vmem:[#allocation48_spill] sm:$0xff] %v1922_v19  ;;  %v384_v21 = vsel %vm287_vm0, %v1914_v3, 0.0  ;;  %v1968_v3 = vld [vmem:[%s1697_s18 + $0x1e8] sm:$0xff] }
  0x37   : > { %v385_v41 = vadd.f32 %v384_v21, %v1922_v19  ;;  %2919 = vst [vmem:[#allocation58_spill] sm:$0xff] %v1968_v3  ;;  %v1971_v19 = vld [vmem:[%s1697_s18 + $0x1f8] sm:$0xff] }
  0x38   : > { %2920 = vst [vmem:[#allocation59_spill] sm:$0xff] %v1971_v19 }
  0x39   : > { %362 = vadd.xlane.f32.xlu0 %v361_v35  ;;  %v1932_v35 = vld [vmem:[%s1697_s18 + $0x1a8] sm:$0xff] }
  0x3a   : > { %366 = vadd.xlane.f32.xlu1 %v365_v37  ;;  %2911 = vst [vmem:[#allocation50_spill] sm:$0xff] %v1932_v35  ;;  %v1935_v37 = vld [vmem:[%s1697_s18 + $0x1b8] sm:$0xff] }
  0x3b   : > { %2912 = vst [vmem:[#allocation51_spill] sm:$0xff] %v1935_v37  ;;  %v396_v61 = vsel %vm287_vm0, %v1935_v37, 0.0 }
  0x3c   : > { %v397_v21 = vadd.f32 %v396_v61, %v1945_v57  ;;  %v408_v61 = vsel %vm287_vm0, %v1968_v3, 0.0 }
  0x3d   : > { %370 = vadd.xlane.f32.xlu0 %v369_v51  ;;  %v1940_v51 = vld [vmem:[%s1697_s18 + $0x1a0] sm:$0xff] }
  0x3e   : > { %374 = vadd.xlane.f32.xlu1 %v373_v53  ;;  %2913 = vst [vmem:[#allocation52_spill] sm:$0xff] %v1940_v51  ;;  %v392_v53 = vsel %vm287_vm0, %v1932_v35, 0.0  ;;  %v400_v35 = vsel %vm287_vm0, %v1950_v7, 0.0  ;;  %v1981_v7 = vld [vmem:[%s1697_s18 + $0x1f0] sm:$0xff] }
  0x3f   : > { %2922 = vst [vmem:[#allocation61_spill] sm:$0xff] %v1981_v7 }
  0x41   : > { %378 = vadd.xlane.f32.xlu0 %v377_v9  ;;  %v1953_v9 = vld [vmem:[%s1697_s18 + $0x1d8] sm:$0xff] }
  0x42   : > { %382 = vadd.xlane.f32.xlu1 %v381_v13  ;;  %2916 = vst [vmem:[#allocation55_spill] sm:$0xff] %v1953_v9  ;;  %v393_v13 = vadd.f32 %v392_v53, %v1940_v51  ;;  %v404_v37 = vsel %vm287_vm0, %v1953_v9, 0.0  ;;  %v1976_v53 = vld [vmem:[%s1697_s18 + $0x1e0] sm:$0xff]  ;;  %v412_v9 = vsel %vm287_vm0, %v1971_v19, 0.0 }
  0x43   : > { %2921 = vst [vmem:[#allocation60_spill] sm:$0xff] %v1976_v53  ;;  %v409_v57 = vadd.f32 %v408_v61, %v1976_v53 }
  0x45   : > { %386 = vadd.xlane.f32.xlu0 %v385_v41  ;;  %v401_v41 = vadd.f32 %v400_v35, %v1958_v29 }
  0x46   : > { %390 = vadd.xlane.f32.xlu1 %v389_v45  ;;  %v405_v45 = vadd.f32 %v404_v37, %v1963_v25 }
  0x49   : > { %394 = vadd.xlane.f32.xlu0 %v393_v13  ;;  %v413_v13 = vadd.f32 %v412_v9, %v1981_v7 }
  0x4a   : > { %398 = vadd.xlane.f32.xlu1 %v397_v21 }
  0x4d   : > { %402 = vadd.xlane.f32.xlu0 %v401_v41 }
  0x4e   : > { %406 = vadd.xlane.f32.xlu1 %v405_v45 }
  0x51   : > { %410 = vadd.xlane.f32.xlu0 %v409_v57 }
  0x52   : > { %414 = vadd.xlane.f32.xlu1 %v413_v13 }
  0x9e   : > { %v291_v35 = vpop.xlane.xlu0 %290 }
  0x9f   : > { %v1987_v37 = vmul.f32 0.0051020407, %v291_v35  ;;  %v299_v21 = vpop.xlane.xlu1 %298 }
  0xa0   : > { %v1989_v25 = vmul.f32 0.0051020407, %v299_v21 }
  0xa1   : > { %2923 = vst [vmem:[#allocation62_spill] sm:$0xff] %v1987_v37  ;;  %v448_v3 = vsub.f32 %v1700_v0, %v1987_v37  ;;  %v449_v19 = vsub.f32 %v1703_v1, %v1987_v37 }
  0xa2   : > { %v295_v41 = vpop.xlane.xlu0 %294  ;;  %v452_v45 = vsub.f32 %v1706_v2, %v1989_v25  ;;  %v453_v57 = vsub.f32 %v1711_v4, %v1989_v25 }
  0xa3   : > { %v1999_v9 = vmul.f32 0.0051020407, %v295_v41  ;;  %v303_v61 = vpop.xlane.xlu1 %302  ;;  %v512_v13 = vmul.f32 %v448_v3, %v448_v3  ;;  %v513_v35 = vmul.f32 %v449_v19, %v449_v19 }
  0xa4   : > { %v2001_v21 = vmul.f32 0.0051020407, %v303_v61  ;;  %v516_v7 = vmul.f32 %v452_v45, %v452_v45  ;;  %v517_v53 = vmul.f32 %v453_v57, %v453_v57 }
  0xa5   : > { %2924 = vst [vmem:[#allocation63_spill] sm:$0xff] %v1999_v9  ;;  %v576_v0 = vsel %vm287_vm0, %v513_v35, 0.0  ;;  %v450_v1 = vsub.f32 %v1714_v5, %v1999_v9  ;;  %v451_v2 = vsub.f32 %v1717_v6, %v1999_v9 }
  0xa6   : > { %v307_v37 = vpop.xlane.xlu0 %306  ;;  %v577_v29 = vadd.f32 %v576_v0, %v512_v13  ;;  %v584_v41 = vsel %vm287_vm0, %v517_v53, 0.0  ;;  %v454_v3 = vsub.f32 %v1725_v10, %v2001_v21  ;;  %v455_v19 = vsub.f32 %v1728_v11, %v2001_v21 }
  0xa7   : > { %v2013_v45 = vmul.f32 0.0051020407, %v307_v37  ;;  %v311_v57 = vpop.xlane.xlu1 %310  ;;  %v514_v61 = vmul.f32 %v450_v1, %v450_v1  ;;  %v515_v35 = vmul.f32 %v451_v2, %v451_v2  ;;  %v585_v4 = vadd.f32 %v584_v41, %v516_v7 }
  0xa8   : > { %578 = vadd.xlane.f32.xlu0 %v577_v29  ;;  %v2015_v5 = vmul.f32 0.0051020407, %v311_v57  ;;  %v518_v6 = vmul.f32 %v454_v3, %v454_v3  ;;  %v519_v9 = vmul.f32 %v455_v19, %v455_v19 }
  0xa9   : > { %v580_v0 = vsel %vm287_vm0, %v515_v35, 0.0  ;;  %v456_v53 = vsub.f32 %v1742_v18, %v2013_v45  ;;  %v457_v10 = vsub.f32 %v1734_v14, %v2013_v45 }
  0xaa   : > { %v315_v11 = vpop.xlane.xlu0 %314  ;;  %v581_v37 = vadd.f32 %v580_v0, %v514_v61  ;;  %v588_v13 = vsel %vm287_vm0, %v519_v9, 0.0  ;;  %v458_v1 = vsub.f32 %v1747_v20, %v2015_v5  ;;  %v459_v2 = vsub.f32 %v1737_v15, %v2015_v5  ;;  %v751_v15 = vld [vmem:[%s2215_s22 + $0x78] sm:$0xff] }
  0xab   : > { %v2027_v7 = vmul.f32 0.0051020407, %v315_v11  ;;  %v319_v29 = vpop.xlane.xlu1 %318  ;;  %v520_v41 = vmul.f32 %v456_v53, %v456_v53  ;;  %v521_v3 = vmul.f32 %v457_v10, %v457_v10  ;;  %v589_v57 = vadd.f32 %v588_v13, %v518_v6 }
  0xac   : > { %586 = vadd.xlane.f32.xlu0 %v585_v4  ;;  %582 = vadd.xlane.f32.xlu1 %v581_v37  ;;  %v2029_v19 = vmul.f32 0.0051020407, %v319_v29  ;;  %v522_v35 = vmul.f32 %v458_v1, %v458_v1  ;;  %v523_v61 = vmul.f32 %v459_v2, %v459_v2 }
  0xad   : > { %v592_v9 = vsel %vm287_vm0, %v521_v3, 0.0  ;;  %v460_v0 = vsub.f32 %v1760_v26, %v2027_v7  ;;  %v461_v14 = vsub.f32 %v1752_v22, %v2027_v7 }
  0xae   : > { %v323_v11 = vpop.xlane.xlu0 %322  ;;  %v593_v18 = vadd.f32 %v592_v9, %v520_v41  ;;  %v596_v53 = vsel %vm287_vm0, %v523_v61, 0.0  ;;  %v462_v4 = vsub.f32 %v1765_v28, %v2029_v19  ;;  %v463_v6 = vsub.f32 %v1755_v23, %v2029_v19 }
  0xaf   : > { %v2041_v10 = vmul.f32 0.0051020407, %v323_v11  ;;  %v327_v37 = vpop.xlane.xlu1 %326  ;;  %v524_v13 = vmul.f32 %v460_v0, %v460_v0  ;;  %v525_v1 = vmul.f32 %v461_v14, %v461_v14  ;;  %v597_v29 = vadd.f32 %v596_v53, %v522_v35 }
  0xb0   : > { %590 = vadd.xlane.f32.xlu1 %v589_v57  ;;  %594 = vadd.xlane.f32.xlu0 %v593_v18  ;;  %v2043_v2 = vmul.f32 0.0051020407, %v327_v37  ;;  %v526_v3 = vmul.f32 %v462_v4, %v462_v4  ;;  %v527_v41 = vmul.f32 %v463_v6, %v463_v6 }
  0xb1   : > { %v600_v61 = vsel %vm287_vm0, %v525_v1, 0.0  ;;  %v464_v9 = vsub.f32 %v1778_v34, %v2041_v10  ;;  %v465_v22 = vsub.f32 %v1770_v30, %v2041_v10 }
  0xb2   : > { %v331_v11 = vpop.xlane.xlu0 %330  ;;  %v601_v26 = vadd.f32 %v600_v61, %v524_v13  ;;  %v604_v0 = vsel %vm287_vm0, %v527_v41, 0.0  ;;  %v466_v14 = vsub.f32 %v1783_v36, %v2043_v2  ;;  %v467_v18 = vsub.f32 %v1773_v31, %v2043_v2  ;;  %v747_v36 = vld [vmem:[%s2215_s22 + $0x58] sm:$0xff] }
  0xb3   : > { %v2055_v57 = vmul.f32 0.0051020407, %v331_v11  ;;  %v335_v35 = vpop.xlane.xlu1 %334  ;;  %v528_v53 = vmul.f32 %v464_v9, %v464_v9  ;;  %v529_v4 = vmul.f32 %v465_v22, %v465_v22  ;;  %v605_v37 = vadd.f32 %v604_v0, %v526_v3 }
  0xb4   : > { %598 = vadd.xlane.f32.xlu1 %v597_v29  ;;  %602 = vadd.xlane.f32.xlu0 %v601_v26  ;;  %v2057_v6 = vmul.f32 0.0051020407, %v335_v35  ;;  %v530_v1 = vmul.f32 %v466_v14, %v466_v14  ;;  %v531_v13 = vmul.f32 %v467_v18, %v467_v18 }
  0xb5   : > { %v608_v41 = vsel %vm287_vm0, %v529_v4, 0.0  ;;  %v468_v61 = vsub.f32 %v1796_v42, %v2055_v57  ;;  %v469_v30 = vsub.f32 %v1788_v38, %v2055_v57 }
  0xb6   : > { %v339_v11 = vpop.xlane.xlu0 %338  ;;  %v609_v34 = vadd.f32 %v608_v41, %v528_v53  ;;  %v612_v9 = vsel %vm287_vm0, %v531_v13, 0.0  ;;  %v470_v22 = vsub.f32 %v1801_v44, %v2057_v6  ;;  %v471_v26 = vsub.f32 %v1791_v39, %v2057_v6 }
  0xb7   : > { %v2069_v29 = vmul.f32 0.0051020407, %v339_v11  ;;  %v343_v3 = vpop.xlane.xlu1 %342  ;;  %v532_v0 = vmul.f32 %v468_v61, %v468_v61  ;;  %v533_v14 = vmul.f32 %v469_v30, %v469_v30  ;;  %v613_v35 = vadd.f32 %v612_v9, %v530_v1 }
  0xb8   : > { %606 = vadd.xlane.f32.xlu1 %v605_v37  ;;  %610 = vadd.xlane.f32.xlu0 %v609_v34  ;;  %v2071_v18 = vmul.f32 0.0051020407, %v343_v3  ;;  %v534_v4 = vmul.f32 %v470_v22, %v470_v22  ;;  %v535_v53 = vmul.f32 %v471_v26, %v471_v26 }
  0xb9   : > { %v616_v13 = vsel %vm287_vm0, %v533_v14, 0.0  ;;  %v472_v41 = vsub.f32 %v1814_v50, %v2069_v29  ;;  %v473_v38 = vsub.f32 %v1806_v46, %v2069_v29 }
  0xba   : > { %v347_v11 = vpop.xlane.xlu0 %346  ;;  %v617_v42 = vadd.f32 %v616_v13, %v532_v0  ;;  %v620_v61 = vsel %vm287_vm0, %v535_v53, 0.0  ;;  %v474_v30 = vsub.f32 %v1819_v52, %v2071_v18  ;;  %v475_v34 = vsub.f32 %v1809_v47, %v2071_v18 }
  0xbb   : > { %v2083_v37 = vmul.f32 0.0051020407, %v347_v11  ;;  %v351_v1 = vpop.xlane.xlu1 %350  ;;  %v536_v9 = vmul.f32 %v472_v41, %v472_v41  ;;  %v537_v22 = vmul.f32 %v473_v38, %v473_v38  ;;  %v621_v3 = vadd.f32 %v620_v61, %v534_v4 }
  0xbc   : > { %614 = vadd.xlane.f32.xlu1 %v613_v35  ;;  %618 = vadd.xlane.f32.xlu0 %v617_v42  ;;  %v2085_v26 = vmul.f32 0.0051020407, %v351_v1  ;;  %v538_v14 = vmul.f32 %v474_v30, %v474_v30  ;;  %v539_v0 = vmul.f32 %v475_v34, %v475_v34 }
  0xbd   : > { %v624_v53 = vsel %vm287_vm0, %v537_v22, 0.0  ;;  %v476_v13 = vsub.f32 %v1832_v58, %v2083_v37  ;;  %v477_v46 = vsub.f32 %v1824_v54, %v2083_v37 }
  0xbe   : > { %v355_v11 = vpop.xlane.xlu0 %354  ;;  %v625_v50 = vadd.f32 %v624_v53, %v536_v9  ;;  %v628_v41 = vsel %vm287_vm0, %v539_v0, 0.0  ;;  %v478_v38 = vsub.f32 %v1837_v60, %v2085_v26  ;;  %v479_v42 = vsub.f32 %v1827_v55, %v2085_v26  ;;  %v742_v60 = vld [vmem:[%s2215_s22 + $0x30] sm:$0xff] }
  0xbf   : > { %v2097_v35 = vmul.f32 0.0051020407, %v355_v11  ;;  %v359_v4 = vpop.xlane.xlu1 %358  ;;  %v540_v61 = vmul.f32 %v476_v13, %v476_v13  ;;  %v541_v30 = vmul.f32 %v477_v46, %v477_v46  ;;  %v629_v1 = vadd.f32 %v628_v41, %v538_v14 }
  0xc0   : > { %622 = vadd.xlane.f32.xlu1 %v621_v3  ;;  %626 = vadd.xlane.f32.xlu0 %v625_v50  ;;  %v2099_v34 = vmul.f32 0.0051020407, %v359_v4  ;;  %v542_v22 = vmul.f32 %v478_v38, %v478_v38  ;;  %v543_v9 = vmul.f32 %v479_v42, %v479_v42 }
  0xc1   : > { %v632_v0 = vsel %vm287_vm0, %v541_v30, 0.0  ;;  %v480_v53 = vsub.f32 %v1850_v8, %v2097_v35  ;;  %v481_v54 = vsub.f32 %v1842_v62, %v2097_v35 }
  0xc2   : > { %v363_v11 = vpop.xlane.xlu0 %362  ;;  %v633_v58 = vadd.f32 %v632_v0, %v540_v61  ;;  %v636_v13 = vsel %vm287_vm0, %v543_v9, 0.0  ;;  %v482_v46 = vsub.f32 %v1855_v12, %v2099_v34  ;;  %v483_v50 = vsub.f32 %v1845_v63, %v2099_v34 }
  0xc3   : > { %v2111_v3 = vmul.f32 0.0051020407, %v363_v11  ;;  %v367_v14 = vpop.xlane.xlu1 %366  ;;  %v544_v41 = vmul.f32 %v480_v53, %v480_v53  ;;  %v545_v38 = vmul.f32 %v481_v54, %v481_v54  ;;  %v637_v4 = vadd.f32 %v636_v13, %v542_v22 }
  0xc4   : > { %630 = vadd.xlane.f32.xlu1 %v629_v1  ;;  %634 = vadd.xlane.f32.xlu0 %v633_v58  ;;  %v2113_v42 = vmul.f32 0.0051020407, %v367_v14  ;;  %v546_v30 = vmul.f32 %v482_v46, %v482_v46  ;;  %v547_v61 = vmul.f32 %v483_v50, %v483_v50  ;;  %v1660_v1 = vmov 0  }
  0xc5   : > { %2925 = vst [vmem:[#allocation64_spill] sm:$0xff] %v2111_v3  ;;  %v640_v9 = vsel %vm287_vm0, %v545_v38, 0.0  ;;  %v484_v0 = vsub.f32 %v1868_v24, %v2111_v3  ;;  %v485_v62 = vsub.f32 %v1860_v16, %v2111_v3  ;;  %1582 = vset.pattern.permute.xlu0 %v1660_v1  ;;  %1583 = vset.pattern.permute.xlu1 %v1660_v1  ;;  %v2348_v3 = vld [vmem:[%s2221_s25 + $0xd0] sm:$0xff] }
  0xc6   : > { %v371_v11 = vpop.xlane.xlu0 %370  ;;  %v641_v8 = vadd.f32 %v640_v9, %v544_v41  ;;  %v644_v53 = vsel %vm287_vm0, %v547_v61, 0.0  ;;  %v486_v54 = vsub.f32 %v1873_v27, %v2113_v42  ;;  %v487_v58 = vsub.f32 %v1863_v17, %v2113_v42  ;;  %v2942_v27 = vld [vmem:[#allocation58_spill] sm:$0xff]  ;;  %2950 = vst [vmem:[#allocation72_spill] sm:$0xff] %v2348_v3  ;;  %v2380_v3 = vld [vmem:[%s2221_s25 + $0xf0] sm:$0xff] }
  0xc7   : > { %v2125_v22 = vmul.f32 0.0051020407, %v371_v11  ;;  %v375_v13 = vpop.xlane.xlu1 %374  ;;  %v548_v46 = vmul.f32 %v484_v0, %v484_v0  ;;  %v549_v50 = vmul.f32 %v485_v62, %v485_v62  ;;  %v645_v41 = vadd.f32 %v644_v53, %v546_v30 }
  0xc8   : > { %638 = vadd.xlane.f32.xlu1 %v637_v4  ;;  %642 = vadd.xlane.f32.xlu0 %v641_v8  ;;  %v2127_v14 = vmul.f32 0.0051020407, %v375_v13  ;;  %v550_v38 = vmul.f32 %v486_v54, %v486_v54  ;;  %v551_v61 = vmul.f32 %v487_v58, %v487_v58 }
  0xc9   : > { %2926 = vst [vmem:[#allocation65_spill] sm:$0xff] %v2125_v22  ;;  %v648_v9 = vsel %vm287_vm0, %v549_v50, 0.0  ;;  %v488_v16 = vsub.f32 %v1886_v40, %v2125_v22  ;;  %v489_v1 = vsub.f32 %v1878_v32, %v2125_v22  ;;  %v2331_v22 = vld [vmem:[%s2221_s25 + $0xc0] sm:$0xff] }
  0xca   : > { %v379_v11 = vpop.xlane.xlu0 %378  ;;  %v649_v24 = vadd.f32 %v648_v9, %v548_v46  ;;  %v652_v0 = vsel %vm287_vm0, %v551_v61, 0.0  ;;  %v490_v62 = vsub.f32 %v1891_v43, %v2127_v14  ;;  %v491_v8 = vsub.f32 %v1881_v33, %v2127_v14  ;;  %v2938_v43 = vld [vmem:[#allocation54_spill] sm:$0xff] }
  0xcb   : > { %v2139_v4 = vmul.f32 0.0051020407, %v379_v11  ;;  %v383_v30 = vpop.xlane.xlu1 %382  ;;  %v552_v53 = vmul.f32 %v488_v16, %v488_v16  ;;  %v553_v54 = vmul.f32 %v489_v1, %v489_v1  ;;  %v653_v13 = vadd.f32 %v652_v0, %v550_v38 }
  0xcc   : > { %646 = vadd.xlane.f32.xlu1 %v645_v41  ;;  %650 = vadd.xlane.f32.xlu0 %v649_v24  ;;  %v2141_v58 = vmul.f32 0.0051020407, %v383_v30  ;;  %v554_v50 = vmul.f32 %v490_v62, %v490_v62  ;;  %v555_v46 = vmul.f32 %v491_v8, %v491_v8 }
  0xcd   : > { %2927 = vst [vmem:[#allocation66_spill] sm:$0xff] %v2139_v4  ;;  %v656_v61 = vsel %vm287_vm0, %v553_v54, 0.0  ;;  %v492_v9 = vsub.f32 %v1904_v56, %v2139_v4  ;;  %v493_v32 = vsub.f32 %v1896_v48, %v2139_v4  ;;  %v2929_v56 = vld [vmem:[#allocation46_spill] sm:$0xff] }
  0xce   : > { %v387_v11 = vpop.xlane.xlu0 %386  ;;  %v657_v40 = vadd.f32 %v656_v61, %v552_v53  ;;  %v660_v16 = vsel %vm287_vm0, %v555_v46, 0.0  ;;  %v494_v24 = vsub.f32 %v1909_v59, %v2141_v58  ;;  %v495_v41 = vsub.f32 %v1899_v49, %v2141_v58  ;;  %v2928_v61 = vld [vmem:[#allocation48_spill] sm:$0xff] }
  0xcf   : > { %v2153_v38 = vmul.f32 0.0051020407, %v387_v11  ;;  %v391_v1 = vpop.xlane.xlu1 %390  ;;  %v556_v0 = vmul.f32 %v492_v9, %v492_v9  ;;  %v557_v62 = vmul.f32 %v493_v32, %v493_v32  ;;  %v661_v30 = vadd.f32 %v660_v16, %v554_v50  ;;  %v2930_v32 = vld [vmem:[#allocation49_spill] sm:$0xff] }
  0xd0   : > { %654 = vadd.xlane.f32.xlu1 %v653_v13  ;;  %658 = vadd.xlane.f32.xlu0 %v657_v40  ;;  %v2155_v8 = vmul.f32 0.0051020407, %v391_v1  ;;  %v558_v54 = vmul.f32 %v494_v24, %v494_v24  ;;  %v559_v53 = vmul.f32 %v495_v41, %v495_v41  ;;  %v2931_v13 = vld [vmem:[#allocation47_spill] sm:$0xff] }
  0xd1   : > { %v664_v46 = vsel %vm287_vm0, %v557_v62, 0.0  ;;  %v496_v48 = vsub.f32 %v2928_v61, %v2153_v38  ;;  %v497_v49 = vsub.f32 %v2929_v56, %v2153_v38 }
  0xd2   : > { %v395_v11 = vpop.xlane.xlu0 %394  ;;  %v665_v59 = vadd.f32 %v664_v46, %v556_v0  ;;  %v668_v9 = vsel %vm287_vm0, %v559_v53, 0.0  ;;  %v498_v40 = vsub.f32 %v2930_v32, %v2155_v8  ;;  %v499_v50 = vsub.f32 %v2931_v13, %v2155_v8  ;;  %v2933_v32 = vld [vmem:[#allocation50_spill] sm:$0xff] }
  0xd3   : > { %v2167_v16 = vmul.f32 0.0051020407, %v395_v11  ;;  %v399_v24 = vpop.xlane.xlu1 %398  ;;  %v560_v41 = vmul.f32 %v496_v48, %v496_v48  ;;  %v561_v1 = vmul.f32 %v497_v49, %v497_v49  ;;  %v669_v56 = vadd.f32 %v668_v9, %v558_v54  ;;  %v2934_v49 = vld [vmem:[#allocation53_spill] sm:$0xff] }
  0xd4   : > { %662 = vadd.xlane.f32.xlu1 %v661_v30  ;;  %666 = vadd.xlane.f32.xlu0 %v665_v59  ;;  %v2169_v62 = vmul.f32 0.0051020407, %v399_v24  ;;  %v562_v61 = vmul.f32 %v498_v40, %v498_v40  ;;  %v563_v0 = vmul.f32 %v499_v50, %v499_v50  ;;  %v2935_v30 = vld [vmem:[#allocation51_spill] sm:$0xff] }
  0xd5   : > { %v672_v53 = vsel %vm287_vm0, %v561_v1, 0.0  ;;  %v500_v46 = vsub.f32 %v1940_v51, %v2167_v16  ;;  %v501_v13 = vsub.f32 %v2933_v32, %v2167_v16 }
  0xd6   : > { %2932 = vst [vmem:[#allocation67_spill] sm:$0xff] %v2169_v62  ;;  %v403_v11 = vpop.xlane.xlu0 %402  ;;  %v673_v33 = vadd.f32 %v672_v53, %v560_v41  ;;  %v676_v48 = vsel %vm287_vm0, %v563_v0, 0.0  ;;  %v502_v59 = vsub.f32 %v2934_v49, %v2169_v62  ;;  %v503_v54 = vsub.f32 %v2935_v30, %v2169_v62  ;;  %v2937_v53 = vld [vmem:[#allocation56_spill] sm:$0xff]  ;;  %v765_v62 = vld [vmem:[%s2215_s22 + $0xe8] sm:$0xff] }
  0xd7   : > { %v2181_v9 = vmul.f32 0.0051020407, %v403_v11  ;;  %v407_v40 = vpop.xlane.xlu1 %406  ;;  %v564_v50 = vmul.f32 %v500_v46, %v500_v46  ;;  %v565_v24 = vmul.f32 %v501_v13, %v501_v13  ;;  %v677_v32 = vadd.f32 %v676_v48, %v562_v61  ;;  %v2940_v13 = vld [vmem:[#allocation55_spill] sm:$0xff] }
  0xd8   : > { %670 = vadd.xlane.f32.xlu1 %v669_v56  ;;  %674 = vadd.xlane.f32.xlu0 %v673_v33  ;;  %v2183_v1 = vmul.f32 0.0051020407, %v407_v40  ;;  %v566_v51 = vmul.f32 %v502_v59, %v502_v59  ;;  %v567_v41 = vmul.f32 %v503_v54, %v503_v54  ;;  %v2939_v56 = vld [vmem:[#allocation57_spill] sm:$0xff] }
  0xd9   : > { %v680_v0 = vsel %vm287_vm0, %v565_v24, 0.0  ;;  %v504_v49 = vsub.f32 %v2937_v53, %v2181_v9  ;;  %v505_v30 = vsub.f32 %v2938_v43, %v2181_v9 }
  0xda   : > { %2936 = vst [vmem:[#allocation68_spill] sm:$0xff] %v2183_v1  ;;  %v411_v11 = vpop.xlane.xlu0 %410  ;;  %v681_v17 = vadd.f32 %v680_v0, %v564_v50  ;;  %v684_v46 = vsel %vm287_vm0, %v567_v41, 0.0  ;;  %v506_v33 = vsub.f32 %v2939_v56, %v2183_v1  ;;  %v507_v61 = vsub.f32 %v2940_v13, %v2183_v1  ;;  %v2941_v0 = vld [vmem:[#allocation60_spill] sm:$0xff] }
  0xdb   : > { %v2195_v48 = vmul.f32 0.0051020407, %v411_v11  ;;  %v415_v59 = vpop.xlane.xlu1 %414  ;;  %v568_v54 = vmul.f32 %v504_v49, %v504_v49  ;;  %v569_v40 = vmul.f32 %v505_v30, %v505_v30  ;;  %v685_v43 = vadd.f32 %v684_v46, %v566_v51  ;;  %v2943_v49 = vld [vmem:[#allocation61_spill] sm:$0xff] }
  0xdc   : > { %678 = vadd.xlane.f32.xlu1 %v677_v32  ;;  %682 = vadd.xlane.f32.xlu0 %v681_v17  ;;  %v2197_v24 = vmul.f32 0.0051020407, %v415_v59  ;;  %v570_v53 = vmul.f32 %v506_v33, %v506_v33  ;;  %v571_v50 = vmul.f32 %v507_v61, %v507_v61  ;;  %v2944_v17 = vld [vmem:[#allocation59_spill] sm:$0xff] }
  0xdd   : > { %v688_v41 = vsel %vm287_vm0, %v569_v40, 0.0  ;;  %v508_v56 = vsub.f32 %v2941_v0, %v2195_v48  ;;  %v509_v13 = vsub.f32 %v2942_v27, %v2195_v48 }
  0xde   : > { %v689_v11 = vadd.f32 %v688_v41, %v568_v54  ;;  %v692_v63 = vsel %vm287_vm0, %v571_v50, 0.0  ;;  %v510_v32 = vsub.f32 %v2943_v49, %v2197_v24  ;;  %v511_v30 = vsub.f32 %v2944_v17, %v2197_v24 }
  0xdf   : > { %v572_v51 = vmul.f32 %v508_v56, %v508_v56  ;;  %v573_v46 = vmul.f32 %v509_v13, %v509_v13  ;;  %v693_v33 = vadd.f32 %v692_v63, %v570_v53 }
  0xe0   : > { %686 = vadd.xlane.f32.xlu1 %v685_v43  ;;  %690 = vadd.xlane.f32.xlu0 %v689_v11  ;;  %v574_v61 = vmul.f32 %v510_v32, %v510_v32  ;;  %v575_v59 = vmul.f32 %v511_v30, %v511_v30 }
  0xe1   : > { %v696_v40 = vsel %vm287_vm0, %v573_v46, 0.0 }
  0xe2   : > { %v697_v0 = vadd.f32 %v696_v40, %v572_v51  ;;  %v700_v54 = vsel %vm287_vm0, %v575_v59, 0.0 }
  0xe3   : > { %v701_v50 = vadd.f32 %v700_v54, %v574_v61 }
  0xe4   : > { %694 = vadd.xlane.f32.xlu1 %v693_v33  ;;  %698 = vadd.xlane.f32.xlu0 %v697_v0 }
  0xe8   : > { %702 = vadd.xlane.f32.xlu1 %v701_v50 }
 0x131   : > { %v579_v41 = vpop.xlane.xlu0 %578 }
 0x132   : > { %v704_v27 = vmul.f32 0.0051020407, %v579_v41  ;;  %v736_v41 = vld [vmem:[%s2215_s22] sm:$0xff] }
 0x134   : > { %v768_v17 = vadd.f32 0.001, %v704_v27 }
 0x135   : > { %v583_v56 = vpop.xlane.xlu1 %582  ;;  %v587_v13 = vpop.xlane.xlu0 %586 }
 0x136   : > { %1584 = vrsqrt.f32 %v768_v17  ;;  %v705_v43 = vmul.f32 0.0051020407, %v583_v56  ;;  %v706_v63 = vmul.f32 0.0051020407, %v587_v13 }
 0x138   : > { %v769_v53 = vadd.f32 0.001, %v705_v43  ;;  %v770_v11 = vadd.f32 0.001, %v706_v63 }
 0x139   : > { %v591_v32 = vpop.xlane.xlu1 %590  ;;  %v595_v30 = vpop.xlane.xlu0 %594 }
 0x13a   : > { %1586 = vrsqrt.f32 %v769_v53  ;;  %v707_v51 = vmul.f32 0.0051020407, %v591_v32  ;;  %v708_v46 = vmul.f32 0.0051020407, %v595_v30  ;;  %v2225_v32 = vld [vmem:[%s2221_s25] sm:$0xff] }
 0x13b   : > { %1588 = vrsqrt.f32 %v770_v11  ;;  %v737_v11 = vld [vmem:[%s2215_s22 + $0x8] sm:$0xff] }
 0x13c   : > { %v771_v0 = vadd.f32 0.001, %v707_v51  ;;  %v772_v33 = vadd.f32 0.001, %v708_v46  ;;  %v2945_v51 = vld [vmem:[#allocation62_spill] sm:$0xff] }
 0x13d   : > { %v599_v61 = vpop.xlane.xlu1 %598  ;;  %v603_v59 = vpop.xlane.xlu0 %602  ;;  %2946 = vst [vmem:[#allocation62_spill] sm:$0xff] %v2331_v22 }
 0x13e   : > { %v710_v40 = vmul.f32 0.0051020407, %v603_v59  ;;  %1590 = vrsqrt.f32 %v772_v33  ;;  %v709_v27 = vmul.f32 0.0051020407, %v599_v61 }
 0x13f   : > { %1592 = vrsqrt.f32 %v771_v0  ;;  %v738_v0 = vld [vmem:[%s2215_s22 + $0x10] sm:$0xff] }
 0x140   : > { %v774_v17 = vadd.f32 0.001, %v710_v40  ;;  %v773_v13 = vadd.f32 0.001, %v709_v27 }
 0x141   : > { %v607_v54 = vpop.xlane.xlu1 %606  ;;  %v611_v50 = vpop.xlane.xlu0 %610 }
 0x142   : > { %1594 = vrsqrt.f32 %v774_v17  ;;  %v711_v59 = vmul.f32 0.0051020407, %v607_v54  ;;  %v712_v54 = vmul.f32 0.0051020407, %v611_v50  ;;  %v2248_v50 = vld [vmem:[%s2221_s25 + $0x20] sm:$0xff] }
 0x143   : > { %v1585_v56 = vpop.eup %1584  ;;  %1596 = vrsqrt.f32 %v773_v13 }
 0x144   : > { %v832_v43 = vmul.f32 %v1585_v56, %v736_v41 }
 0x145   : > { %v615_v63 = vpop.xlane.xlu1 %614  ;;  %v619_v53 = vpop.xlane.xlu0 %618 }
 0x146   : > { %v713_v30 = vmul.f32 0.0051020407, %v615_v63  ;;  %962 = vperm.xlu0 %1582, %v832_v43   ;;  %v2228_v46 = vmul.f32 %v832_v43, %v2945_v51  ;;  %v740_v43 = vld [vmem:[%s2215_s22 + $0x20] sm:$0xff]  ;;  %v2238_v51 = vld [vmem:[%s2221_s25 + $0x10] sm:$0xff]  ;;  %v714_v47 = vmul.f32 0.0051020407, %v619_v53 }
 0x147   : > { %v1587_v33 = vpop.eup %1586  ;;  %v2259_v53 = vld [vmem:[%s2221_s25 + $0x30] sm:$0xff] }
 0x148   : > { %v1589_v61 = vpop.eup %1588  ;;  %v777_v40 = vadd.f32 0.001, %v713_v30  ;;  %v2231_v27 = vmul.f32 %v1587_v33, %v737_v11  ;;  %v775_v30 = vadd.f32 0.001, %v711_v59 }
 0x149   : > { %v623_v41 = vpop.xlane.xlu1 %622  ;;  %v627_v56 = vpop.xlane.xlu0 %626  ;;  %v834_v63 = vmul.f32 %v1589_v61, %v738_v0  ;;  %v739_v0 = vld [vmem:[%s2215_s22 + $0x18] sm:$0xff] }
 0x14a   : > { %1598 = vrsqrt.f32 %v777_v40  ;;  %v715_v49 = vmul.f32 0.0051020407, %v623_v41  ;;  %967 = vperm.xlu1 %1583, %v2231_v27  }
 0x14b   : > { %v2241_v13 = vmul.f32 %v834_v63, %v1989_v25  ;;  %v1591_v11 = vpop.eup %1590  ;;  %v776_v25 = vadd.f32 0.001, %v712_v54  ;;  %v716_v54 = vmul.f32 0.0051020407, %v627_v56 }
 0x14c   : > { %v779_v33 = vadd.f32 0.001, %v715_v49  ;;  %v1593_v17 = vpop.eup %1592  ;;  %v836_v61 = vmul.f32 %v1591_v11, %v740_v43 }
 0x14d   : > { %v631_v12 = vpop.xlane.xlu1 %630  ;;  %v635_v55 = vpop.xlane.xlu0 %634  ;;  %v2253_v39 = vmul.f32 %v1593_v17, %v739_v0 }
 0x14e   : > { %1600 = vrsqrt.f32 %v779_v33  ;;  %v717_v41 = vmul.f32 0.0051020407, %v631_v12  ;;  %972 = vperm.xlu1 %1583, %v834_v63   ;;  %v2251_v59 = vmul.f32 %v836_v61, %v2013_v45  ;;  %v778_v45 = vadd.f32 0.001, %v714_v47 }
 0x14f   : > { %v1595_v49 = vpop.eup %1594  ;;  %1602 = vrsqrt.f32 %v775_v30  ;;  %v780_v47 = vadd.f32 0.001, %v716_v54  ;;  %v718_v56 = vmul.f32 0.0051020407, %v635_v55 }
 0x150   : > { %v781_v52 = vadd.f32 0.001, %v717_v41  ;;  %v838_v12 = vmul.f32 %v1595_v49, %v742_v60  ;;  %v1597_v30 = vpop.eup %1596  ;;  %v745_v60 = vld [vmem:[%s2215_s22 + $0x48] sm:$0xff] }
 0x151   : > { %v639_v43 = vpop.xlane.xlu1 %638  ;;  %v643_v11 = vpop.xlane.xlu0 %642  ;;  %v741_v49 = vld [vmem:[%s2215_s22 + $0x28] sm:$0xff] }
 0x152   : > { %1604 = vrsqrt.f32 %v781_v52  ;;  %v719_v33 = vmul.f32 0.0051020407, %v639_v43  ;;  %977 = vperm.xlu1 %1583, %v2253_v39   ;;  %v2262_v17 = vmul.f32 %v838_v12, %v2027_v7  ;;  %v2270_v44 = vmul.f32 %v1597_v30, %v741_v49  ;;  %v749_v49 = vld [vmem:[%s2215_s22 + $0x68] sm:$0xff] }
 0x153   : > { %1606 = vrsqrt.f32 %v776_v25  ;;  %v720_v55 = vmul.f32 0.0051020407, %v643_v11 }
 0x154   : > { %v783_v0 = vadd.f32 0.001, %v719_v33 }
 0x155   : > { %v647_v41 = vpop.xlane.xlu1 %646  ;;  %v651_v40 = vpop.xlane.xlu0 %650  ;;  %v784_v11 = vadd.f32 0.001, %v720_v55 }
 0x156   : > { %1608 = vrsqrt.f32 %v783_v0  ;;  %v721_v43 = vmul.f32 0.0051020407, %v647_v41  ;;  %982 = vperm.xlu1 %1583, %v836_v61   ;;  %v722_v0 = vmul.f32 0.0051020407, %v651_v40  ;;  %v744_v40 = vld [vmem:[%s2215_s22 + $0x40] sm:$0xff] }
 0x157   : > { %v1599_v63 = vpop.eup %1598  ;;  %1610 = vrsqrt.f32 %v778_v45  ;;  %v782_v45 = vadd.f32 0.001, %v718_v56 }
 0x158   : > { %v785_v25 = vadd.f32 0.001, %v721_v43  ;;  %v2268_v7 = vmul.f32 %v1599_v63, %v745_v60  ;;  %v743_v43 = vld [vmem:[%s2215_s22 + $0x38] sm:$0xff] }
 0x159   : > { %v655_v33 = vpop.xlane.xlu1 %654  ;;  %v659_v31 = vpop.xlane.xlu0 %658 }
 0x15a   : > { %1612 = vrsqrt.f32 %v785_v25  ;;  %v723_v23 = vmul.f32 0.0051020407, %v655_v33  ;;  %1007 = vperm.xlu0 %1582, %v2268_v7   ;;  %987 = vperm.xlu1 %1583, %v2270_v44   ;;  %v724_v52 = vmul.f32 0.0051020407, %v659_v31 }
 0x15b   : > { %v1601_v61 = vpop.eup %1600  ;;  %1614 = vrsqrt.f32 %v780_v47 }
 0x15c   : > { %v787_v54 = vadd.f32 0.001, %v723_v23  ;;  %v2275_v63 = vmul.f32 %v1601_v61, %v747_v36  ;;  %v1603_v30 = vpop.eup %1602  ;;  %v786_v61 = vadd.f32 0.001, %v722_v0 }
 0x15d   : > { %v663_v41 = vpop.xlane.xlu1 %662  ;;  %v667_v60 = vpop.xlane.xlu0 %666  ;;  %v2282_v56 = vmul.f32 %v1603_v30, %v743_v43  ;;  %v746_v43 = vld [vmem:[%s2215_s22 + $0x50] sm:$0xff] }
 0x15e   : > { %1616 = vrsqrt.f32 %v787_v54  ;;  %v725_v25 = vmul.f32 0.0051020407, %v663_v41  ;;  %1017 = vperm.xlu0 %1582, %v2275_v63   ;;  %992 = vperm.xlu1 %1583, %v838_v12  }
 0x15f   : > { %v1605_v33 = vpop.eup %1604  ;;  %1618 = vrsqrt.f32 %v782_v45 }
 0x160   : > { %v1607_v47 = vpop.eup %1606  ;;  %v789_v23 = vadd.f32 0.001, %v725_v25  ;;  %v2280_v36 = vmul.f32 %v1605_v33, %v749_v49  ;;  %v788_v25 = vadd.f32 0.001, %v724_v52 }
 0x161   : > { %v671_v28 = vpop.xlane.xlu1 %670  ;;  %v675_v54 = vpop.xlane.xlu0 %674  ;;  %v2288_v55 = vmul.f32 %v1607_v47, %v744_v40 }
 0x162   : > { %1620 = vrsqrt.f32 %v789_v23  ;;  %v727_v41 = vmul.f32 0.0051020407, %v671_v28  ;;  %v728_v12 = vmul.f32 0.0051020407, %v675_v54  ;;  %1027 = vperm.xlu0 %1582, %v2280_v36   ;;  %997 = vperm.xlu1 %1583, %v2282_v56   ;;  %v753_v23 = vld [vmem:[%s2215_s22 + $0x88] sm:$0xff] }
 0x163   : > { %v1609_v45 = vpop.eup %1608  ;;  %1622 = vrsqrt.f32 %v784_v11 }
 0x164   : > { %v1611_v30 = vpop.eup %1610  ;;  %v791_v49 = vadd.f32 0.001, %v727_v41  ;;  %v792_v0 = vadd.f32 0.001, %v728_v12  ;;  %v2290_v31 = vmul.f32 %v1609_v45, %v751_v15  ;;  %1624 = vrsqrt.f32 %v786_v61  ;;  %v748_v15 = vld [vmem:[%s2215_s22 + $0x60] sm:$0xff] }
 0x165   : > { %v679_v28 = vpop.xlane.xlu1 %678  ;;  %v683_v33 = vpop.xlane.xlu0 %682  ;;  %v2296_v11 = vmul.f32 %v1611_v30, %v746_v43  ;;  %v726_v41 = vmul.f32 0.0051020407, %v667_v60 }
 0x166   : > { %1626 = vrsqrt.f32 %v791_v49  ;;  %v729_v54 = vmul.f32 0.0051020407, %v679_v28  ;;  %v730_v20 = vmul.f32 0.0051020407, %v683_v33  ;;  %1037 = vperm.xlu0 %1582, %v2290_v31   ;;  %1002 = vperm.xlu1 %1583, %v2288_v55   ;;  %v755_v28 = vld [vmem:[%s2215_s22 + $0x98] sm:$0xff] }
 0x167   : > { %v1613_v47 = vpop.eup %1612  ;;  %1628 = vrsqrt.f32 %v792_v0  ;;  %v750_v0 = vld [vmem:[%s2215_s22 + $0x70] sm:$0xff]  ;;  %v790_v43 = vadd.f32 0.001, %v726_v41 }
 0x168   : > { %v1615_v40 = vpop.eup %1614  ;;  %v793_v52 = vadd.f32 0.001, %v729_v54  ;;  %v794_v61 = vadd.f32 0.001, %v730_v20  ;;  %v2299_v12 = vmul.f32 %v1613_v47, %v753_v23  ;;  %1630 = vrsqrt.f32 %v788_v25 }
 0x169   : > { %v687_v45 = vpop.xlane.xlu1 %686  ;;  %v691_v49 = vpop.xlane.xlu0 %690  ;;  %v2304_v60 = vmul.f32 %v1615_v40, %v748_v15 }
 0x16a   : > { %1632 = vrsqrt.f32 %v793_v52  ;;  %v731_v33 = vmul.f32 0.0051020407, %v687_v45  ;;  %v732_v4 = vmul.f32 0.0051020407, %v691_v49  ;;  %1047 = vperm.xlu0 %1582, %v2299_v12   ;;  %1012 = vperm.xlu1 %1583, %v2296_v11   ;;  %v757_v45 = vld [vmem:[%s2215_s22 + $0xa8] sm:$0xff] }
 0x16b   : > { %v1617_v30 = vpop.eup %1616  ;;  %1634 = vrsqrt.f32 %v794_v61 }
 0x16c   : > { %v1619_v20 = vpop.eup %1618  ;;  %v795_v23 = vadd.f32 0.001, %v731_v33  ;;  %v796_v25 = vadd.f32 0.001, %v732_v4  ;;  %v2307_v54 = vmul.f32 %v1617_v30, %v755_v28  ;;  %v759_v30 = vld [vmem:[%s2215_s22 + $0xb8] sm:$0xff] }
 0x16d   : > { %v695_v47 = vpop.xlane.xlu1 %694  ;;  %v699_v52 = vpop.xlane.xlu0 %698  ;;  %v2312_v40 = vmul.f32 %v1619_v20, %v750_v0  ;;  %v760_v0 = vld [vmem:[%s2215_s22 + $0xc0] sm:$0xff] }
 0x16e   : > { %1636 = vrsqrt.f32 %v795_v23  ;;  %v733_v49 = vmul.f32 0.0051020407, %v695_v47  ;;  %v734_v1 = vmul.f32 0.0051020407, %v699_v52  ;;  %1057 = vperm.xlu0 %1582, %v2307_v54   ;;  %1022 = vperm.xlu1 %1583, %v2304_v60   ;;  %v752_v23 = vld [vmem:[%s2215_s22 + $0x80] sm:$0xff] }
 0x16f   : > { %v1621_v15 = vpop.eup %1620  ;;  %1638 = vrsqrt.f32 %v796_v25 }
 0x170   : > { %1640 = vrsqrt.f32 %v790_v43  ;;  %v797_v4 = vadd.f32 0.001, %v733_v49  ;;  %v798_v41 = vadd.f32 0.001, %v734_v1  ;;  %v2314_v61 = vmul.f32 %v1621_v15, %v757_v45  ;;  %v1623_v28 = vpop.eup %1622  ;;  %v761_v49 = vld [vmem:[%s2215_s22 + $0xc8] sm:$0xff]  ;;  %v754_v15 = vld [vmem:[%s2215_s22 + $0x90] sm:$0xff] }
 0x171   : > { %v703_v33 = vpop.xlane.xlu1 %702  ;;  %v1625_v47 = vpop.eup %1624  ;;  %v2323_v45 = vmul.f32 %v1623_v28, %v752_v23 }
 0x172   : > { %1642 = vrsqrt.f32 %v797_v4  ;;  %v735_v52 = vmul.f32 0.0051020407, %v703_v33  ;;  %1067 = vperm.xlu0 %1582, %v2314_v61   ;;  %1032 = vperm.xlu1 %1583, %v2312_v40  }
 0x173   : > { %v1627_v20 = vpop.eup %1626  ;;  %1644 = vrsqrt.f32 %v798_v41  ;;  %v762_v41 = vld [vmem:[%s2215_s22 + $0xd0] sm:$0xff] }
 0x174   : > { %v1629_v1 = vpop.eup %1628  ;;  %v799_v43 = vadd.f32 0.001, %v735_v52  ;;  %v2321_v25 = vmul.f32 %v1627_v20, %v759_v30  ;;  %v763_v20 = vld [vmem:[%s2215_s22 + $0xd8] sm:$0xff] }
 0x175   : > { %v856_v4 = vmul.f32 %v1629_v1, %v760_v0  ;;  %v1631_v33 = vpop.eup %1630  ;;  %v2338_v0 = vmul.f32 %v1625_v47, %v754_v15  ;;  %v756_v1 = vld [vmem:[%s2215_s22 + $0xa0] sm:$0xff] }
 0x176   : > { %1646 = vrsqrt.f32 %v799_v43  ;;  %1077 = vperm.xlu0 %1582, %v2321_v25   ;;  %1042 = vperm.xlu1 %1583, %v2323_v45  }
 0x177   : > { %v1633_v30 = vpop.eup %1632  ;;  %v2334_v52 = vmul.f32 %v856_v4, %v2153_v38  ;;  %2949 = vst [vmem:[#allocation71_spill] sm:$0xff] %v2338_v0  ;;  %v764_v38 = vld [vmem:[%s2215_s22 + $0xe0] sm:$0xff] }
 0x178   : > { %v1635_v28 = vpop.eup %1634  ;;  %v2336_v23 = vmul.f32 %v1633_v30, %v761_v49 }
 0x179   : > { %2947 = vst [vmem:[#allocation69_spill] sm:$0xff] %v2334_v52  ;;  %v858_v43 = vmul.f32 %v1635_v28, %v762_v41  ;;  %v2355_v41 = vmul.f32 %v1631_v33, %v756_v1  ;;  %v758_v52 = vld [vmem:[%s2215_s22 + $0xb0] sm:$0xff] }
 0x17a   : > { %2948 = vst [vmem:[#allocation70_spill] sm:$0xff] %v2336_v23  ;;  %1087 = vperm.xlu0 %1582, %v2336_v23   ;;  %1052 = vperm.xlu1 %1583, %v2338_v0   ;;  %v2365_v23 = vld [vmem:[%s2221_s25 + $0xe0] sm:$0xff] }
 0x17b   : > { %v1637_v49 = vpop.eup %1636  ;;  %v2351_v47 = vmul.f32 %v858_v43, %v2167_v16  ;;  %2952 = vst [vmem:[#allocation74_spill] sm:$0xff] %v2355_v41  ;;  %v766_v16 = vld [vmem:[%s2215_s22 + $0xf0] sm:$0xff] }
 0x17c   : > { %v1639_v15 = vpop.eup %1638  ;;  %v2353_v30 = vmul.f32 %v1637_v49, %v763_v20 }
 0x17d   : > { %2951 = vst [vmem:[#allocation73_spill] sm:$0xff] %v2351_v47  ;;  %v1641_v28 = vpop.eup %1640  ;;  %v860_v22 = vmul.f32 %v1639_v15, %v764_v38  ;;  %v767_v15 = vld [vmem:[%s2215_s22 + $0xf8] sm:$0xff] }
 0x17e   : > { %1097 = vperm.xlu0 %1582, %v2353_v30   ;;  %1062 = vperm.xlu1 %1583, %v2355_v41   ;;  %v2372_v38 = vmul.f32 %v1641_v28, %v758_v52  ;;  %v865_v28 = vld [vmem:[%s2221_s25 + $0x8] sm:$0xff] }
 0x17f   : > { %v1643_v20 = vpop.eup %1642  ;;  %v2368_v33 = vmul.f32 %v860_v22, %v2181_v9 }
 0x180   : > { %v1645_v1 = vpop.eup %1644  ;;  %v2370_v49 = vmul.f32 %v1643_v20, %v765_v62  ;;  %v2954_v20 = vld [vmem:[#allocation63_spill] sm:$0xff] }
 0x181   : > { %2953 = vst [vmem:[#allocation75_spill] sm:$0xff] %v2368_v33  ;;  %v862_v0 = vmul.f32 %v1645_v1, %v766_v16  ;;  %v897_v52 = vmul.f32 %v2231_v27, %v2954_v20  ;;  %v2389_v16 = vld [vmem:[%s2221_s25 + $0xf8] sm:$0xff]  ;;  %v901_v20 = vmul.f32 %v2270_v44, %v2015_v5  ;;  %v2955_v44 = vsub.f32 %v2225_v32, %v2228_v46 }
 0x182   : > { %1107 = vperm.xlu0 %1582, %v2370_v49   ;;  %1072 = vperm.xlu1 %1583, %v2372_v38   ;;  %v867_v27 = vld [vmem:[%s2221_s25 + $0x18] sm:$0xff]  ;;  %v907_v5 = vmul.f32 %v2275_v63, %v2057_v6  ;;  %v2957_v32 = vsub.f32 %v2248_v50, %v2251_v59  ;;  %v911_v6 = vmul.f32 %v2290_v31, %v2085_v26  ;;  %v872_v63 = vld [vmem:[%s2221_s25 + $0x40] sm:$0xff]  ;;  %v881_v31 = vld [vmem:[%s2221_s25 + $0x88] sm:$0xff] }
 0x183   : > { %v1647_v41 = vpop.eup %1646  ;;  %v2383_v9 = vmul.f32 %v862_v0, %v2195_v48  ;;  %v929_v33 = vsub.f32 %v865_v28, %v897_v52  ;;  %v899_v48 = vmul.f32 %v2253_v39, %v2001_v21  ;;  %v871_v39 = vld [vmem:[%s2221_s25 + $0x38] sm:$0xff]  ;;  %v905_v21 = vmul.f32 %v2268_v7, %v2043_v2 }
 0x184   : > { %v863_v62 = vmul.f32 %v1647_v41, %v767_v15  ;;  %v909_v2 = vmul.f32 %v2280_v36, %v2071_v18  ;;  %v904_v46 = vmul.f32 %v2288_v55, %v2041_v10  ;;  %v2958_v18 = vsub.f32 %v2259_v53, %v2262_v17  ;;  %v874_v10 = vld [vmem:[%s2221_s25 + $0x50] sm:$0xff] }
 0x185   : > { %v958_v1 = vsub.f32 %v2380_v3, %v2383_v9  ;;  %v931_v15 = vsub.f32 %v867_v27, %v899_v48  ;;  %v913_v50 = vmul.f32 %v2299_v12, %v2099_v34  ;;  %v906_v59 = vmul.f32 %v2296_v11, %v2055_v57  ;;  %v883_v34 = vld [vmem:[%s2221_s25 + $0x98] sm:$0xff]  ;;  %v876_v12 = vld [vmem:[%s2221_s25 + $0x60] sm:$0xff] }
 0x186   : > { %v2394_v47 = vmul.f32 %v863_v62, %v2197_v24  ;;  %1117 = vperm.xlu0 %1582, %v863_v62   ;;  %1082 = vperm.xlu1 %1583, %v856_v4   ;;  %v869_v24 = vld [vmem:[%s2221_s25 + $0x28] sm:$0xff]  ;;  %v903_v62 = vmul.f32 %v2282_v56, %v2029_v19  ;;  %v2956_v56 = vsub.f32 %v2238_v51, %v2241_v13  ;;  %v879_v13 = vld [vmem:[%s2221_s25 + $0x78] sm:$0xff] }
 0x187   : > { %v933_v4 = vsub.f32 %v869_v24, %v901_v20  ;;  %v943_v26 = vsub.f32 %v879_v13, %v911_v6  ;;  %v936_v36 = vsub.f32 %v872_v63, %v904_v46  ;;  %v915_v55 = vmul.f32 %v2307_v54, %v2113_v42  ;;  %v885_v42 = vld [vmem:[%s2221_s25 + $0xa8] sm:$0xff]  ;;  %v878_v54 = vld [vmem:[%s2221_s25 + $0x70] sm:$0xff]  ;;  %v2967_v63 = vld [vmem:[#allocation62_spill] sm:$0xff] }
 0x188   : > { %v959_v41 = vsub.f32 %v2389_v16, %v2394_v47  ;;  %v908_v53 = vmul.f32 %v2304_v60, %v2069_v29  ;;  %v945_v17 = vsub.f32 %v881_v31, %v913_v50  ;;  %v938_v52 = vsub.f32 %v874_v10, %v906_v59  ;;  %v2960_v20 = vld [vmem:[#allocation64_spill] sm:$0xff]  ;;  %v2961_v24 = vld [vmem:[#allocation71_spill] sm:$0xff]  ;;  %v2971_v59 = vld [vmem:[#allocation73_spill] sm:$0xff] }
 0x189   : > { %v917_v57 = vmul.f32 %v2314_v61, %v2127_v14  ;;  %v910_v11 = vmul.f32 %v2312_v40, %v2083_v37  ;;  %v947_v28 = vsub.f32 %v883_v34, %v915_v55  ;;  %v919_v29 = vmul.f32 %v2321_v25, %v2141_v58  ;;  %v887_v14 = vld [vmem:[%s2221_s25 + $0xb8] sm:$0xff]  ;;  %v880_v61 = vld [vmem:[%s2221_s25 + $0x80] sm:$0xff]  ;;  %v889_v58 = vld [vmem:[%s2221_s25 + $0xc8] sm:$0xff] }
 0x18a   : > { %1191 = vperm.xlu0 %1582, %v929_v33   ;;  %1092 = vperm.xlu1 %1583, %v858_v43   ;;  %v935_v43 = vsub.f32 %v871_v39, %v903_v62  ;;  %v873_v33 = vld [vmem:[%s2221_s25 + $0x48] sm:$0xff]  ;;  %v940_v48 = vsub.f32 %v876_v12, %v908_v53  ;;  %v912_v60 = vmul.f32 %v2323_v45, %v2097_v35  ;;  %v2959_v37 = vld [vmem:[#allocation70_spill] sm:$0xff]  ;;  %v882_v25 = vld [vmem:[%s2221_s25 + $0x90] sm:$0xff] }
 0x18b   : > { %v937_v19 = vsub.f32 %v873_v33, %v905_v21  ;;  %v949_v27 = vsub.f32 %v885_v42, %v917_v57  ;;  %v921_v40 = vmul.f32 %v2959_v37, %v2155_v8  ;;  %v951_v62 = vsub.f32 %v887_v14, %v919_v29  ;;  %v2962_v35 = vld [vmem:[#allocation67_spill] sm:$0xff]  ;;  %v2963_v21 = vld [vmem:[#allocation65_spill] sm:$0xff]  ;;  %v886_v46 = vld [vmem:[%s2221_s25 + $0xb0] sm:$0xff] }
 0x18c   : > { %v944_v39 = vsub.f32 %v880_v61, %v912_v60  ;;  %v923_v45 = vmul.f32 %v2353_v30, %v2962_v35  ;;  %v891_v8 = vld [vmem:[%s2221_s25 + $0xd8] sm:$0xff]  ;;  %v893_v6 = vld [vmem:[%s2221_s25 + $0xe8] sm:$0xff]  ;;  %v2970_v50 = vld [vmem:[#allocation72_spill] sm:$0xff] }
 0x18d   : > { %v2973_v31 = vld [vmem:[#allocation75_spill] sm:$0xff]  ;;  %v1650_v35 = vld [vmem:[%s1697_s18 + $0x30] sm:$0xff] }
 0x18e   : > { %1201 = vperm.xlu0 %1582, %v931_v15   ;;  %1102 = vperm.xlu1 %1583, %v860_v22   ;;  %v875_v22 = vld [vmem:[%s2221_s25 + $0x58] sm:$0xff]  ;;  %v942_v15 = vsub.f32 %v878_v54, %v910_v11  ;;  %v2974_v10 = vsub.f32 %v2365_v23, %v2973_v31 }
 0x18f   : > { %v939_v7 = vsub.f32 %v875_v22, %v907_v5  ;;  %v2965_v22 = vld [vmem:[#allocation68_spill] sm:$0xff] }
 0x192   : > { %1211 = vperm.xlu0 %1582, %v933_v4   ;;  %1112 = vperm.xlu1 %1583, %v862_v0   ;;  %v877_v0 = vld [vmem:[%s2221_s25 + $0x68] sm:$0xff]  ;;  %v914_v4 = vmul.f32 %v2961_v24, %v2960_v20  ;;  %v1649_v24 = vld [vmem:[%s1697_s18 + $0x18] sm:$0xff] }
 0x193   : > { %v941_v51 = vsub.f32 %v877_v0, %v909_v2  ;;  %v2966_v2 = vld [vmem:[#allocation66_spill] sm:$0xff]  ;;  %v955_v0 = vsub.f32 %v891_v8, %v923_v45 }
 0x194   : > { %v946_v5 = vsub.f32 %v882_v25, %v914_v4 }
 0x196   : > { %1221 = vperm.xlu0 %1582, %v935_v43   ;;  %1186 = vperm.xlu1 %1583, %v2955_v44   ;;  %v2964_v43 = vld [vmem:[#allocation74_spill] sm:$0xff]  ;;  %v953_v44 = vsub.f32 %v889_v58, %v921_v40  ;;  %v1648_v40 = vld [vmem:[%s1697_s18 + $0x10] sm:$0xff] }
 0x197   : > { %v916_v33 = vmul.f32 %v2964_v43, %v2963_v21  ;;  %v1651_v21 = vld [vmem:[%s1697_s18 + $0x38] sm:$0xff] }
 0x19a   : > { %1231 = vperm.xlu0 %1582, %v937_v19   ;;  %1196 = vperm.xlu1 %1583, %v2956_v56   ;;  %v884_v19 = vld [vmem:[%s2221_s25 + $0xa0] sm:$0xff]  ;;  %v925_v56 = vmul.f32 %v2370_v49, %v2965_v22  ;;  %v2968_v49 = vld [vmem:[#allocation69_spill] sm:$0xff] }
 0x19c   : > { %v957_v30 = vsub.f32 %v893_v6, %v925_v56  ;;  %v2976_v56 = vld [vmem:[#allocation7_spill] sm:$0xff] }
 0x19e   : > { %1241 = vperm.xlu0 %1582, %v939_v7   ;;  %1206 = vperm.xlu1 %1583, %v2957_v32   ;;  %v918_v7 = vmul.f32 %v2372_v38, %v2966_v2  ;;  %v948_v32 = vsub.f32 %v884_v19, %v916_v33  ;;  %v2975_v19 = vld [vmem:[#allocation9_spill] sm:$0xff] }
 0x1a2   : > { %1251 = vperm.xlu0 %1582, %v941_v51   ;;  %1216 = vperm.xlu1 %1583, %v2958_v18   ;;  %v950_v51 = vsub.f32 %v886_v46, %v918_v7  ;;  %v2969_v18 = vsub.f32 %v2967_v63, %v2968_v49  ;;  %v2977_v46 = vld [vmem:[#allocation2_spill] sm:$0xff]  ;;  %v2979_v63 = vld [vmem:[#allocation13_spill] sm:$0xff] }
 0x1a6   : > { %1261 = vperm.xlu0 %1582, %v943_v26   ;;  %1226 = vperm.xlu1 %1583, %v936_v36   ;;  %v2972_v26 = vsub.f32 %v2970_v50, %v2971_v59 }
 0x1aa   : > { %1271 = vperm.xlu0 %1582, %v945_v17   ;;  %1236 = vperm.xlu1 %1583, %v938_v52  }
 0x1ae   : > { %1281 = vperm.xlu0 %1582, %v947_v28   ;;  %1246 = vperm.xlu1 %1583, %v940_v48  }
 0x1b2   : > { %1291 = vperm.xlu0 %1582, %v949_v27   ;;  %1256 = vperm.xlu1 %1583, %v942_v15  }
 0x1b6   : > { %1301 = vperm.xlu0 %1582, %v951_v62   ;;  %1266 = vperm.xlu1 %1583, %v944_v39  }
 0x1ba   : > { %1311 = vperm.xlu0 %1582, %v953_v44   ;;  %1276 = vperm.xlu1 %1583, %v946_v5  }
 0x1be   : > { %1321 = vperm.xlu0 %1582, %v955_v0   ;;  %1286 = vperm.xlu1 %1583, %v948_v32  }
 0x1c1   : > { %v963_v55 = vpop.permute.xlu0 %962 }
 0x1c2   : > { %1331 = vperm.xlu0 %1582, %v957_v30   ;;  %1296 = vperm.xlu1 %1583, %v950_v51   ;;  %v1120_v30 = vmul.f32 %v963_v55, %v2977_v46  ;;  %v2978_v51 = vld [vmem:[#allocation3_spill] sm:$0xff] }
 0x1c5   : > { %v968_v13 = vpop.permute.xlu1 %967 }
 0x1c6   : > { %1341 = vperm.xlu0 %1582, %v959_v41   ;;  %1306 = vperm.xlu1 %1583, %v2969_v18   ;;  %v1122_v20 = vmul.f32 %v1648_v40, %v968_v13  ;;  %v1123_v4 = vmul.f32 %v1649_v24, %v968_v13  ;;  %v1121_v13 = vmul.f32 %v963_v55, %v2978_v51  ;;  %v2980_v18 = vld [vmem:[#allocation11_spill] sm:$0xff]  ;;  %v2981_v40 = vld [vmem:[#allocation4_spill] sm:$0xff]  ;;  %v2982_v55 = vld [vmem:[#allocation5_spill] sm:$0xff] }
 0x1c7   : > { %v2989_v51 = vld [vmem:[#allocation12_spill] sm:$0xff] }
 0x1c9   : > { %v2482_v38 = vpop.permute.xlu1 %972 }
 0x1ca   : > { %1316 = vperm.xlu1 %1583, %v2972_v26   ;;  %v1125_v24 = vmul.f32 %v2482_v38, %v2982_v55  ;;  %v2994_v55 = vld [vmem:[#allocation14_spill] sm:$0xff] }
 0x1cd   : > { %v978_v36 = vpop.permute.xlu1 %977 }
 0x1ce   : > { %1326 = vperm.xlu1 %1583, %v2974_v10   ;;  %v1126_v45 = vmul.f32 %v1650_v35, %v978_v36  ;;  %v1127_v43 = vmul.f32 %v1651_v21, %v978_v36 }
 0x1d1   : > { %v2490_v53 = vpop.permute.xlu1 %982 }
 0x1d2   : > { %1336 = vperm.xlu1 %1583, %v958_v1  }
 0x1d5   : > { %v988_v47 = vpop.permute.xlu1 %987  ;;  %v2495_v16 = vpop.permute.xlu0 %1007 }
 0x1d6   : > { %v1130_v22 = vmul.f32 %v988_v47, %v2975_v19  ;;  %v1131_v2 = vmul.f32 %v988_v47, %v2976_v56  ;;  %v2987_v19 = vld [vmem:[#allocation21_spill] sm:$0xff]  ;;  %v2988_v56 = vld [vmem:[#allocation19_spill] sm:$0xff] }
 0x1d9   : > { %v2497_v41 = vpop.permute.xlu1 %992  ;;  %v2499_v17 = vpop.permute.xlu0 %1017 }
 0x1dd   : > { %v998_v52 = vpop.permute.xlu1 %997  ;;  %v2501_v34 = vpop.permute.xlu0 %1027 }
 0x1de   : > { %v1134_v49 = vmul.f32 %v998_v52, %v2979_v63  ;;  %v1135_v50 = vmul.f32 %v998_v52, %v2980_v18  ;;  %v2984_v52 = vld [vmem:[#allocation15_spill] sm:$0xff]  ;;  %v2990_v63 = vld [vmem:[#allocation10_spill] sm:$0xff] }
 0x1e1   : > { %v2503_v12 = vpop.permute.xlu1 %1002  ;;  %v2505_v23 = vpop.permute.xlu0 %1037 }
 0x1e5   : > { %v2507_v57 = vpop.permute.xlu1 %1012  ;;  %v2509_v11 = vpop.permute.xlu0 %1047 }
 0x1e9   : > { %v2511_v3 = vpop.permute.xlu1 %1022  ;;  %v2513_v9 = vpop.permute.xlu0 %1057 }
 0x1ed   : > { %v2515_v1 = vpop.permute.xlu1 %1032  ;;  %v2517_v28 = vpop.permute.xlu0 %1067 }
 0x1f1   : > { %v2519_v48 = vpop.permute.xlu1 %1042  ;;  %v2521_v42 = vpop.permute.xlu0 %1077 }
 0x1f5   : > { %v2523_v54 = vpop.permute.xlu1 %1052  ;;  %v2525_v29 = vpop.permute.xlu0 %1087 }
 0x1f9   : > { %v2527_v60 = vpop.permute.xlu1 %1062  ;;  %v2529_v27 = vpop.permute.xlu0 %1097 }
 0x1fd   : > { %v2531_v15 = vpop.permute.xlu1 %1072  ;;  %v2533_v14 = vpop.permute.xlu0 %1107 }
 0x201   : > { %v2535_v61 = vpop.permute.xlu1 %1082  ;;  %v2537_v37 = vpop.permute.xlu0 %1117 }
 0x205   : > { %v2548_v62 = vpop.permute.xlu1 %1092  ;;  %v1192_v39 = vpop.permute.xlu0 %1191 }
 0x206   : > { %v1346_v58 = vadd.f32 %v1192_v39, %v1122_v20  ;;  %v1347_v25 = vadd.f32 %v1192_v39, %v1123_v4  ;;  %v1124_v20 = vmul.f32 %v2482_v38, %v2981_v40  ;;  %v2983_v4 = vld [vmem:[#allocation17_spill] sm:$0xff]  ;;  %v2993_v40 = vld [vmem:[#allocation16_spill] sm:$0xff] }
 0x207   : > { %v1138_v39 = vmul.f32 %v2495_v16, %v2983_v4 }
 0x208   : > { %1410 = vst [vmem:[%s2546_s28 + $0x10] sm:$0xff] %v1346_v58  ;;  %1411 = vst.msk [vmem:[%s2546_s28 + $0x18] sm:$0xff] %vm287_vm0, %v1347_v25  ;;  %v1139_v58 = vmul.f32 %v2495_v16, %v2984_v52 }
 0x209   : > { %v2555_v33 = vpop.permute.xlu1 %1102  ;;  %v1202_v44 = vpop.permute.xlu0 %1201 }
 0x20a   : > { %v1350_v5 = vadd.f32 %v1202_v44, %v1126_v45  ;;  %v1351_v8 = vadd.f32 %v1202_v44, %v1127_v43  ;;  %v2985_v44 = vld [vmem:[#allocation8_spill] sm:$0xff] }
 0x20c   : > { %1414 = vst [vmem:[%s2546_s28 + $0x30] sm:$0xff] %v1350_v5  ;;  %1415 = vst.msk [vmem:[%s2546_s28 + $0x38] sm:$0xff] %vm287_vm0, %v1351_v8  ;;  %v1128_v5 = vmul.f32 %v2490_v53, %v2985_v44  ;;  %v2986_v8 = vld [vmem:[#allocation6_spill] sm:$0xff] }
 0x20d   : > { %v2562_v7 = vpop.permute.xlu1 %1112  ;;  %v1212_v0 = vpop.permute.xlu0 %1211  ;;  %v1129_v16 = vmul.f32 %v2490_v53, %v2986_v8  ;;  %v2998_v44 = vld [vmem:[#allocation18_spill] sm:$0xff] }
 0x20e   : > { %v1354_v32 = vadd.f32 %v1212_v0, %v1130_v22  ;;  %v1355_v6 = vadd.f32 %v1212_v0, %v1131_v2  ;;  %v1142_v22 = vmul.f32 %v2499_v17, %v2987_v19  ;;  %v1143_v2 = vmul.f32 %v2499_v17, %v2988_v56 }
 0x20f   : > { %v1133_v17 = vmul.f32 %v2497_v41, %v2990_v63 }
 0x210   : > { %1418 = vst [vmem:[%s2546_s28 + $0x50] sm:$0xff] %v1354_v32  ;;  %1419 = vst.msk [vmem:[%s2546_s28 + $0x58] sm:$0xff] %vm287_vm0, %v1355_v6 }
 0x211   : > { %v1187_v59 = vpop.permute.xlu1 %1186  ;;  %v1222_v26 = vpop.permute.xlu0 %1221 }
 0x212   : > { %v1344_v36 = vadd.f32 %v1187_v59, %v1120_v30  ;;  %v1345_v31 = vadd.f32 %v1187_v59, %v1121_v13  ;;  %v1358_v10 = vadd.f32 %v1222_v26, %v1134_v49  ;;  %v1359_v47 = vadd.f32 %v1222_v26, %v1135_v50  ;;  %v2991_v49 = vld [vmem:[#allocation25_spill] sm:$0xff]  ;;  %v2992_v50 = vld [vmem:[#allocation23_spill] sm:$0xff] }
 0x213   : > { %v1132_v13 = vmul.f32 %v2497_v41, %v2989_v51  ;;  %v1146_v18 = vmul.f32 %v2501_v34, %v2991_v49  ;;  %v1147_v59 = vmul.f32 %v2501_v34, %v2992_v50  ;;  %v1137_v34 = vmul.f32 %v2503_v12, %v2994_v55 }
 0x214   : > { %1408 = vst [vmem:[%s2546_s28] sm:$0xff] %v1344_v36  ;;  %1409 = vst.msk [vmem:[%s2546_s28 + $0x8] sm:$0xff] %vm287_vm0, %v1345_v31 }
 0x215   : > { %1422 = vst [vmem:[%s2546_s28 + $0x70] sm:$0xff] %v1358_v10  ;;  %1423 = vst.msk [vmem:[%s2546_s28 + $0x78] sm:$0xff] %vm287_vm0, %v1359_v47  ;;  %v1197_v25 = vpop.permute.xlu1 %1196  ;;  %v1232_v35 = vpop.permute.xlu0 %1231 }
 0x216   : > { %v1348_v45 = vadd.f32 %v1197_v25, %v1124_v20  ;;  %v1349_v38 = vadd.f32 %v1197_v25, %v1125_v24  ;;  %v1362_v21 = vadd.f32 %v1232_v35, %v1138_v39  ;;  %v1363_v43 = vadd.f32 %v1232_v35, %v1139_v58  ;;  %v2995_v24 = vld [vmem:[#allocation29_spill] sm:$0xff]  ;;  %v2996_v39 = vld [vmem:[#allocation27_spill] sm:$0xff] }
 0x217   : > { %v1136_v20 = vmul.f32 %v2503_v12, %v2993_v40  ;;  %v1150_v4 = vmul.f32 %v2505_v23, %v2995_v24  ;;  %v1151_v52 = vmul.f32 %v2505_v23, %v2996_v39  ;;  %v1141_v23 = vmul.f32 %v2507_v57, %v2998_v44  ;;  %v3009_v39 = vld [vmem:[#allocation32_spill] sm:$0xff] }
 0x218   : > { %1412 = vst [vmem:[%s2546_s28 + $0x20] sm:$0xff] %v1348_v45  ;;  %1413 = vst.msk [vmem:[%s2546_s28 + $0x28] sm:$0xff] %vm287_vm0, %v1349_v38 }
 0x219   : > { %1426 = vst [vmem:[%s2546_s28 + $0x90] sm:$0xff] %v1362_v21  ;;  %1427 = vst.msk [vmem:[%s2546_s28 + $0x98] sm:$0xff] %vm287_vm0, %v1363_v43  ;;  %v1207_v0 = vpop.permute.xlu1 %1206  ;;  %v1242_v32 = vpop.permute.xlu0 %1241  ;;  %v2997_v21 = vld [vmem:[#allocation20_spill] sm:$0xff] }
 0x21a   : > { %v1352_v6 = vadd.f32 %v1207_v0, %v1128_v5  ;;  %v1353_v53 = vadd.f32 %v1207_v0, %v1129_v16  ;;  %v1366_v46 = vadd.f32 %v1242_v32, %v1142_v22  ;;  %v1367_v30 = vadd.f32 %v1242_v32, %v1143_v2  ;;  %v2999_v5 = vld [vmem:[#allocation33_spill] sm:$0xff]  ;;  %v3000_v16 = vld [vmem:[#allocation31_spill] sm:$0xff] }
 0x21b   : > { %v1140_v43 = vmul.f32 %v2507_v57, %v2997_v21  ;;  %v1154_v8 = vmul.f32 %v2509_v11, %v2999_v5  ;;  %v1155_v19 = vmul.f32 %v2509_v11, %v3000_v16  ;;  %v3013_v5 = vld [vmem:[#allocation36_spill] sm:$0xff]  ;;  %v3014_v16 = vld [vmem:[#allocation34_spill] sm:$0xff] }
 0x21c   : > { %1416 = vst [vmem:[%s2546_s28 + $0x40] sm:$0xff] %v1352_v6  ;;  %1417 = vst.msk [vmem:[%s2546_s28 + $0x48] sm:$0xff] %vm287_vm0, %v1353_v53  ;;  %v3001_v6 = vld [vmem:[#allocation24_spill] sm:$0xff] }
 0x21d   : > { %1430 = vst [vmem:[%s2546_s28 + $0xb0] sm:$0xff] %v1366_v46  ;;  %1431 = vst.msk [vmem:[%s2546_s28 + $0xb8] sm:$0xff] %vm287_vm0, %v1367_v30  ;;  %v1217_v26 = vpop.permute.xlu1 %1216  ;;  %v1252_v36 = vpop.permute.xlu0 %1251  ;;  %v1144_v53 = vmul.f32 %v2511_v3, %v3001_v6  ;;  %v3002_v46 = vld [vmem:[#allocation22_spill] sm:$0xff]  ;;  %v3003_v30 = vld [vmem:[#allocation37_spill] sm:$0xff] }
 0x21e   : > { %v1356_v31 = vadd.f32 %v1217_v26, %v1132_v13  ;;  %v1357_v41 = vadd.f32 %v1217_v26, %v1133_v17  ;;  %v1370_v10 = vadd.f32 %v1252_v36, %v1146_v18  ;;  %v1371_v47 = vadd.f32 %v1252_v36, %v1147_v59  ;;  %v3004_v13 = vld [vmem:[#allocation35_spill] sm:$0xff]  ;;  %v3005_v26 = vld [vmem:[#allocation28_spill] sm:$0xff] }
 0x21f   : > { %v1145_v11 = vmul.f32 %v2511_v3, %v3002_v46  ;;  %v1158_v51 = vmul.f32 %v2513_v9, %v3003_v30  ;;  %v1159_v63 = vmul.f32 %v2513_v9, %v3004_v13  ;;  %v1148_v36 = vmul.f32 %v2515_v1, %v3005_v26  ;;  %v3017_v46 = vld [vmem:[#allocation40_spill] sm:$0xff]  ;;  %v3018_v30 = vld [vmem:[#allocation38_spill] sm:$0xff] }
 0x220   : > { %1420 = vst [vmem:[%s2546_s28 + $0x60] sm:$0xff] %v1356_v31  ;;  %1421 = vst.msk [vmem:[%s2546_s28 + $0x68] sm:$0xff] %vm287_vm0, %v1357_v41  ;;  %v3006_v31 = vld [vmem:[#allocation26_spill] sm:$0xff]  ;;  %v3007_v41 = vld [vmem:[#allocation41_spill] sm:$0xff] }
 0x221   : > { %1434 = vst [vmem:[%s2546_s28 + $0xd0] sm:$0xff] %v1370_v10  ;;  %1435 = vst.msk [vmem:[%s2546_s28 + $0xd8] sm:$0xff] %vm287_vm0, %v1371_v47  ;;  %v1227_v58 = vpop.permute.xlu1 %1226  ;;  %v1262_v25 = vpop.permute.xlu0 %1261  ;;  %v1149_v9 = vmul.f32 %v2515_v1, %v3006_v31  ;;  %v1162_v10 = vmul.f32 %v2517_v28, %v3007_v41  ;;  %v3008_v47 = vld [vmem:[#allocation39_spill] sm:$0xff]  ;;  %v3021_v26 = vld [vmem:[#allocation44_spill] sm:$0xff] }
 0x222   : > { %v1360_v35 = vadd.f32 %v1227_v58, %v1136_v20  ;;  %v1361_v12 = vadd.f32 %v1227_v58, %v1137_v34  ;;  %v1374_v45 = vadd.f32 %v1262_v25, %v1150_v4  ;;  %v1375_v38 = vadd.f32 %v1262_v25, %v1151_v52  ;;  %v3010_v58 = vld [vmem:[#allocation30_spill] sm:$0xff]  ;;  %v3011_v25 = vld [vmem:[#allocation45_spill] sm:$0xff] }
 0x223   : > { %v1163_v40 = vmul.f32 %v2517_v28, %v3008_v47  ;;  %v1152_v52 = vmul.f32 %v2519_v48, %v3009_v39  ;;  %v1153_v28 = vmul.f32 %v2519_v48, %v3010_v58  ;;  %v3022_v31 = vld [vmem:[#allocation42_spill] sm:$0xff] }
 0x224   : > { %1424 = vst [vmem:[%s2546_s28 + $0x80] sm:$0xff] %v1360_v35  ;;  %1425 = vst.msk [vmem:[%s2546_s28 + $0x88] sm:$0xff] %vm287_vm0, %v1361_v12  ;;  %v1166_v35 = vmul.f32 %v2521_v42, %v3011_v25  ;;  %v3012_v12 = vld [vmem:[#allocation43_spill] sm:$0xff]  ;;  %v3026_v39 = vld [vmem:[#allocation46_spill] sm:$0xff] }
 0x225   : > { %1438 = vst [vmem:[%s2546_s28 + $0xf0] sm:$0xff] %v1374_v45  ;;  %1439 = vst.msk [vmem:[%s2546_s28 + $0xf8] sm:$0xff] %vm287_vm0, %v1375_v38  ;;  %v1237_v22 = vpop.permute.xlu1 %1236  ;;  %v1272_v56 = vpop.permute.xlu0 %1271  ;;  %v1167_v45 = vmul.f32 %v2521_v42, %v3012_v12  ;;  %v1157_v42 = vmul.f32 %v2523_v54, %v3014_v16  ;;  %v3031_v16 = vld [vmem:[#allocation56_spill] sm:$0xff] }
 0x226   : > { %v1364_v2 = vadd.f32 %v1237_v22, %v1140_v43  ;;  %v1365_v57 = vadd.f32 %v1237_v22, %v1141_v23  ;;  %v1378_v0 = vadd.f32 %v1272_v56, %v1154_v8  ;;  %v1379_v32 = vadd.f32 %v1272_v56, %v1155_v19  ;;  %v3015_v19 = vld [vmem:[#allocation49_spill] sm:$0xff]  ;;  %v3016_v56 = vld [vmem:[#allocation47_spill] sm:$0xff] }
 0x227   : > { %v1156_v8 = vmul.f32 %v2523_v54, %v3013_v5  ;;  %v1170_v22 = vmul.f32 %v2525_v29, %v3015_v19  ;;  %v3032_v19 = vld [vmem:[#allocation54_spill] sm:$0xff] }
 0x228   : > { %1428 = vst [vmem:[%s2546_s28 + $0xa0] sm:$0xff] %v1364_v2  ;;  %1429 = vst.msk [vmem:[%s2546_s28 + $0xa8] sm:$0xff] %vm287_vm0, %v1365_v57  ;;  %v1171_v2 = vmul.f32 %v2525_v29, %v3016_v56  ;;  %v1161_v29 = vmul.f32 %v2527_v60, %v3018_v30 }
 0x229   : > { %1442 = vst [vmem:[%s2546_s28 + $0x110] sm:$0xff] %v1378_v0  ;;  %1443 = vst.msk [vmem:[%s2546_s28 + $0x118] sm:$0xff] %vm287_vm0, %v1379_v32  ;;  %v1247_v17 = vpop.permute.xlu1 %1246  ;;  %v1282_v49 = vpop.permute.xlu0 %1281 }
 0x22a   : > { %v1368_v18 = vadd.f32 %v1247_v17, %v1144_v53  ;;  %v1369_v3 = vadd.f32 %v1247_v17, %v1145_v11  ;;  %v1382_v50 = vadd.f32 %v1282_v49, %v1158_v51  ;;  %v1383_v59 = vadd.f32 %v1282_v49, %v1159_v63  ;;  %v3019_v51 = vld [vmem:[#allocation53_spill] sm:$0xff]  ;;  %v3020_v63 = vld [vmem:[#allocation51_spill] sm:$0xff] }
 0x22b   : > { %v1160_v11 = vmul.f32 %v2527_v60, %v3017_v46  ;;  %v1174_v13 = vmul.f32 %v2529_v27, %v3019_v51  ;;  %v1175_v17 = vmul.f32 %v2529_v27, %v3020_v63  ;;  %v1165_v27 = vmul.f32 %v2531_v15, %v3022_v31 }
 0x22c   : > { %1432 = vst [vmem:[%s2546_s28 + $0xc0] sm:$0xff] %v1368_v18  ;;  %1433 = vst.msk [vmem:[%s2546_s28 + $0xc8] sm:$0xff] %vm287_vm0, %v1369_v3 }
 0x22d   : > { %1446 = vst [vmem:[%s2546_s28 + $0x130] sm:$0xff] %v1382_v50  ;;  %1447 = vst.msk [vmem:[%s2546_s28 + $0x138] sm:$0xff] %vm287_vm0, %v1383_v59  ;;  %v1257_v20 = vpop.permute.xlu1 %1256  ;;  %v1292_v55 = vpop.permute.xlu0 %1291 }
 0x22e   : > { %v1372_v34 = vadd.f32 %v1257_v20, %v1148_v36  ;;  %v1373_v1 = vadd.f32 %v1257_v20, %v1149_v9  ;;  %v1386_v24 = vadd.f32 %v1292_v55, %v1162_v10  ;;  %v1387_v4 = vadd.f32 %v1292_v55, %v1163_v40  ;;  %v3023_v9 = vld [vmem:[#allocation57_spill] sm:$0xff]  ;;  %v3024_v10 = vld [vmem:[#allocation55_spill] sm:$0xff] }
 0x22f   : > { %v1164_v36 = vmul.f32 %v2531_v15, %v3021_v26  ;;  %v1178_v41 = vmul.f32 %v2533_v14, %v3023_v9  ;;  %v1179_v47 = vmul.f32 %v2533_v14, %v3024_v10  ;;  %v1169_v14 = vmul.f32 %v2535_v61, %v3026_v39 }
 0x230   : > { %1436 = vst [vmem:[%s2546_s28 + $0xe0] sm:$0xff] %v1372_v34  ;;  %1437 = vst.msk [vmem:[%s2546_s28 + $0xe8] sm:$0xff] %vm287_vm0, %v1373_v1 }
 0x231   : > { %1450 = vst [vmem:[%s2546_s28 + $0x150] sm:$0xff] %v1386_v24  ;;  %1451 = vst.msk [vmem:[%s2546_s28 + $0x158] sm:$0xff] %vm287_vm0, %v1387_v4  ;;  %v1267_v38 = vpop.permute.xlu1 %1266  ;;  %v1302_v21 = vpop.permute.xlu0 %1301  ;;  %v3025_v24 = vld [vmem:[#allocation48_spill] sm:$0xff] }
 0x232   : > { %v1376_v43 = vadd.f32 %v1267_v38, %v1152_v52  ;;  %v1377_v48 = vadd.f32 %v1267_v38, %v1153_v28  ;;  %v1390_v44 = vadd.f32 %v1302_v21, %v1166_v35  ;;  %v1391_v23 = vadd.f32 %v1302_v21, %v1167_v45  ;;  %v3027_v52 = vld [vmem:[#allocation61_spill] sm:$0xff]  ;;  %v3028_v28 = vld [vmem:[#allocation59_spill] sm:$0xff] }
 0x233   : > { %v1168_v4 = vmul.f32 %v2535_v61, %v3025_v24  ;;  %v1182_v58 = vmul.f32 %v2537_v37, %v3027_v52  ;;  %v1183_v25 = vmul.f32 %v2537_v37, %v3028_v28 }
 0x234   : > { %1440 = vst [vmem:[%s2546_s28 + $0x100] sm:$0xff] %v1376_v43  ;;  %1441 = vst.msk [vmem:[%s2546_s28 + $0x108] sm:$0xff] %vm287_vm0, %v1377_v48  ;;  %v3029_v43 = vld [vmem:[#allocation52_spill] sm:$0xff] }
 0x235   : > { %1454 = vst [vmem:[%s2546_s28 + $0x170] sm:$0xff] %v1390_v44  ;;  %1455 = vst.msk [vmem:[%s2546_s28 + $0x178] sm:$0xff] %vm287_vm0, %v1391_v23  ;;  %v1277_v57 = vpop.permute.xlu1 %1276  ;;  %v1312_v0 = vpop.permute.xlu0 %1311  ;;  %v1172_v48 = vmul.f32 %v2548_v62, %v3029_v43  ;;  %v3030_v44 = vld [vmem:[#allocation50_spill] sm:$0xff] }
 0x236   : > { %v1380_v32 = vadd.f32 %v1277_v57, %v1156_v8  ;;  %v1381_v54 = vadd.f32 %v1277_v57, %v1157_v42  ;;  %v1394_v6 = vadd.f32 %v1312_v0, %v1170_v22  ;;  %v1395_v53 = vadd.f32 %v1312_v0, %v1171_v2  ;;  %v3033_v57 = vld [vmem:[#allocation60_spill] sm:$0xff] }
 0x237   : > { %v1173_v37 = vmul.f32 %v2548_v62, %v3030_v44  ;;  %v1176_v42 = vmul.f32 %v2555_v33, %v3031_v16  ;;  %v1177_v22 = vmul.f32 %v2555_v33, %v3032_v19  ;;  %v1180_v0 = vmul.f32 %v2562_v7, %v3033_v57 }
 0x238   : > { %1444 = vst [vmem:[%s2546_s28 + $0x120] sm:$0xff] %v1380_v32  ;;  %1445 = vst.msk [vmem:[%s2546_s28 + $0x128] sm:$0xff] %vm287_vm0, %v1381_v54  ;;  %v3034_v32 = vld [vmem:[#allocation58_spill] sm:$0xff] }
 0x239   : > { %1458 = vst [vmem:[%s2546_s28 + $0x190] sm:$0xff] %v1394_v6  ;;  %1459 = vst.msk [vmem:[%s2546_s28 + $0x198] sm:$0xff] %vm287_vm0, %v1395_v53  ;;  %v1287_v49 = vpop.permute.xlu1 %1286  ;;  %v1322_v18 = vpop.permute.xlu0 %1321  ;;  %v1181_v54 = vmul.f32 %v2562_v7, %v3034_v32 }
 0x23a   : > { %v1384_v3 = vadd.f32 %v1287_v49, %v1160_v11  ;;  %v1385_v60 = vadd.f32 %v1287_v49, %v1161_v29  ;;  %v1398_v50 = vadd.f32 %v1322_v18, %v1174_v13  ;;  %v1399_v59 = vadd.f32 %v1322_v18, %v1175_v17 }
 0x23c   : > { %1448 = vst [vmem:[%s2546_s28 + $0x140] sm:$0xff] %v1384_v3  ;;  %1449 = vst.msk [vmem:[%s2546_s28 + $0x148] sm:$0xff] %vm287_vm0, %v1385_v60 }
 0x23d   : > { %1462 = vst [vmem:[%s2546_s28 + $0x1b0] sm:$0xff] %v1398_v50  ;;  %1463 = vst.msk [vmem:[%s2546_s28 + $0x1b8] sm:$0xff] %vm287_vm0, %v1399_v59  ;;  %v1297_v40 = vpop.permute.xlu1 %1296  ;;  %v1332_v20 = vpop.permute.xlu0 %1331 }
 0x23e   : > { %v1388_v55 = vadd.f32 %v1297_v40, %v1164_v36  ;;  %v1389_v15 = vadd.f32 %v1297_v40, %v1165_v27  ;;  %v1402_v34 = vadd.f32 %v1332_v20, %v1178_v41  ;;  %v1403_v1 = vadd.f32 %v1332_v20, %v1179_v47 }
 0x240   : > { %1452 = vst [vmem:[%s2546_s28 + $0x160] sm:$0xff] %v1388_v55  ;;  %1453 = vst.msk [vmem:[%s2546_s28 + $0x168] sm:$0xff] %vm287_vm0, %v1389_v15 }
 0x241   : > { %1466 = vst [vmem:[%s2546_s28 + $0x1d0] sm:$0xff] %v1402_v34  ;;  %1467 = vst.msk [vmem:[%s2546_s28 + $0x1d8] sm:$0xff] %vm287_vm0, %v1403_v1  ;;  %v1307_v35 = vpop.permute.xlu1 %1306  ;;  %v1342_v12 = vpop.permute.xlu0 %1341 }
 0x242   : > { %v1392_v45 = vadd.f32 %v1307_v35, %v1168_v4  ;;  %v1393_v61 = vadd.f32 %v1307_v35, %v1169_v14  ;;  %v1406_v38 = vadd.f32 %v1342_v12, %v1182_v58  ;;  %v1407_v21 = vadd.f32 %v1342_v12, %v1183_v25 }
 0x244   : > { %1456 = vst [vmem:[%s2546_s28 + $0x180] sm:$0xff] %v1392_v45  ;;  %1457 = vst.msk [vmem:[%s2546_s28 + $0x188] sm:$0xff] %vm287_vm0, %v1393_v61 }
 0x245   : > { %1470 = vst [vmem:[%s2546_s28 + $0x1f0] sm:$0xff] %v1406_v38  ;;  %1471 = vst.msk [vmem:[%s2546_s28 + $0x1f8] sm:$0xff] %vm287_vm0, %v1407_v21  ;;  %v1317_v23 = vpop.permute.xlu1 %1316 }
 0x246   : > { %v1396_v5 = vadd.f32 %v1317_v23, %v1172_v48  ;;  %v1397_v8 = vadd.f32 %v1317_v23, %v1173_v37 }
 0x248   : > { %1460 = vst [vmem:[%s2546_s28 + $0x1a0] sm:$0xff] %v1396_v5  ;;  %1461 = vst.msk [vmem:[%s2546_s28 + $0x1a8] sm:$0xff] %vm287_vm0, %v1397_v8 }
 0x249   : > { %v1327_v62 = vpop.permute.xlu1 %1326 }
 0x24a   : > { %v1400_v56 = vadd.f32 %v1327_v62, %v1176_v42  ;;  %v1401_v2 = vadd.f32 %v1327_v62, %v1177_v22 }
 0x24c   : > { %1464 = vst [vmem:[%s2546_s28 + $0x1c0] sm:$0xff] %v1400_v56  ;;  %1465 = vst.msk [vmem:[%s2546_s28 + $0x1c8] sm:$0xff] %vm287_vm0, %v1401_v2 }
 0x24d   : > { %v1337_v6 = vpop.permute.xlu1 %1336 }
 0x24e   : > { %v1404_v53 = vadd.f32 %v1337_v6, %v1180_v0  ;;  %v1405_v46 = vadd.f32 %v1337_v6, %v1181_v54 }
 0x250   : > { %1468 = vst [vmem:[%s2546_s28 + $0x1e0] sm:$0xff] %v1404_v53  ;;  %1469 = vst.msk [vmem:[%s2546_s28 + $0x1e8] sm:$0xff] %vm287_vm0, %v1405_v46 }
 0x251 PF: > { %s13_s12 = sadd.s32 1, %s1658_s12  }
 0x252   : > { %p10_p4 = scmp.ge.s32.totalorder %s13_s12, 5  }
 0x254   :  { %12 = sbr.rel (!%p10_p4) target bundleno = 1 (0x1), region = 68 }

</bundles_post_ra>
